<compile_context>
chip_gen: v5e
topology: v5e:2x2
jax: 0.10.0
libtpu: 0.0.40
codegen_flags: <defaults>
</compile_context>

<pallas_src>
import functools

import jax
import jax.numpy as jnp
import numpy as np
from jax.experimental import pallas as pl
from jax.experimental.pallas import tpu as pltpu

# ----------------------------- model hyper-parameters -----------------------------
BATCH = 8
INPUT_DIM = 16
D_MODEL = 32
NHEAD = 4
NUM_LAYERS = 2
OUTPUT_DIM = 1
DIM_FF = 2048          # nn.TransformerEncoderLayer default dim_feedforward
LN_EPS = 1e-5


# ----------------------------------- kernel ---------------------------------------
def _layer_norm(y, g, b):
    mu = jnp.mean(y, axis=-1, keepdims=True)
    var = jnp.mean((y - mu) ** 2, axis=-1, keepdims=True)
    return (y - mu) * jax.lax.rsqrt(var + LN_EPS) * g + b


def transformer_kernel(x_ref, w_emb_ref, b_emb_ref,
                       w_sa_ref, b_sa_ref,
                       ln1g_ref, ln1b_ref,
                       f1w_ref, f1b_ref, f2w_ref, f2b_ref,
                       ln2g_ref, ln2b_ref,
                       fcw_ref, fcb_ref,
                       out_ref, h_ref):
    l = pl.program_id(0)

    # ---- embedding (only on the first grid step) ----
    @pl.when(l == 0)
    def _():
        h_ref[...] = (jnp.dot(x_ref[...], w_emb_ref[...],
                              preferred_element_type=jnp.float32)
                      + b_emb_ref[...])

    h = h_ref[...]                                    # (B, D) f32 running activation

    # ---- multi-head self-attention, seq_len == 1 ----
    # softmax over a single key is exactly 1.0, so attention == out_proj(V(x));
    # V-proj and out_proj are pre-folded on the host into w_sa / b_sa.
    sa = jnp.dot(h.astype(w_sa_ref.dtype), w_sa_ref[...],
                 preferred_element_type=jnp.float32) + b_sa_ref[...]
    h = _layer_norm(h + sa, ln1g_ref[...], ln1b_ref[...])

    # ---- feed-forward (relu), bf16 weights / f32 accumulation ----
    ff = jnp.dot(h.astype(f1w_ref.dtype), f1w_ref[...],
                 preferred_element_type=jnp.float32) + f1b_ref[...]
    ff = jnp.maximum(ff, 0.0)
    ff = jnp.dot(ff.astype(f2w_ref.dtype), f2w_ref[...],
                 preferred_element_type=jnp.float32) + f2b_ref[...]
    h = _layer_norm(h + ff, ln2g_ref[...], ln2b_ref[...])

    h_ref[...] = h

    # ---- final fc (only on the last grid step) ----
    @pl.when(l == pl.num_programs(0) - 1)
    def _():
        out_ref[...] = (jnp.dot(h, fcw_ref[...],
                                preferred_element_type=jnp.float32)
                        + fcb_ref[...]).astype(out_ref.dtype)


# ----------------------- host-side weight preparation (one-time) -------------------
def prepare_kernel_params(params):
    """Pre-transpose, fold V+out_proj, and cast big weights to bf16."""
    L = NUM_LAYERS
    w_v = params["in_w"][:, 2]                              # (L, D, D)
    b_v = params["in_b"][:, 2]                              # (L, 1, D)
    w_o = params["out_w"]                                   # (L, D, D)
    # sa = (h @ Wv^T + bv) @ Wo^T + bo  ==  h @ (Wv^T Wo^T) + (bv @ Wo^T + bo)
    w_sa = jnp.einsum("lij,lkj->lik",
                      jnp.transpose(w_v, (0, 2, 1)), w_o)   # (L, D, D), (in, out)
    b_sa = jnp.einsum("lrd,lkd->lrk", b_v, w_o) + params["out_b"]   # (L, 1, D)

    return {
        "w_emb_t": params["w_emb"].T.astype(jnp.float32),            # (IN, D)
        "b_emb":   params["b_emb"].astype(jnp.float32),              # (1, D)
        "w_sa":    w_sa.astype(jnp.bfloat16),                        # (L, D, D)
        "b_sa":    b_sa.astype(jnp.float32),                         # (L, 1, D)
        "ln1_g":   params["ln1_g"].astype(jnp.float32),
        "ln1_b":   params["ln1_b"].astype(jnp.float32),
        "f1_w_t":  jnp.transpose(params["f1_w"], (0, 2, 1)).astype(jnp.bfloat16),  # (L, D, FF)
        "f1_b":    params["f1_b"].astype(jnp.float32),               # (L, 1, FF)
        "f2_w_t":  jnp.transpose(params["f2_w"], (0, 2, 1)).astype(jnp.bfloat16),  # (L, FF, D)
        "f2_b":    params["f2_b"].astype(jnp.float32),               # (L, 1, D)
        "ln2_g":   params["ln2_g"].astype(jnp.float32),
        "ln2_b":   params["ln2_b"].astype(jnp.float32),
        "fc_w_t":  params["fc_w"].T.astype(jnp.float32),             # (D, OUT)
        "fc_b":    params["fc_b"].astype(jnp.float32),               # (1, OUT)
    }


@jax.jit
def transformer_forward(x, kp):
    B = x.shape[0]
    L, D, FF, OUT, IN = NUM_LAYERS, D_MODEL, DIM_FF, OUTPUT_DIM, INPUT_DIM

    # Constant (non layer-indexed) arrays: same block every grid step -> DMA'd once.
    const2d = lambda shape: pl.BlockSpec(shape, lambda l: (0, 0))
    # Layer-indexed arrays: leading layer dim is squeezed, block selected by program_id.
    per_layer = lambda shape: pl.BlockSpec((None,) + shape, lambda l: (l, 0, 0))

    in_specs = [
        const2d((B, IN)),          # x
        const2d((IN, D)),          # w_emb_t
        const2d((1, D)),           # b_emb
        per_layer((D, D)),         # w_sa
        per_layer((1, D)),         # b_sa
        per_layer((1, D)),         # ln1_g
        per_layer((1, D)),         # ln1_b
        per_layer((D, FF)),        # f1_w_t
        per_layer((1, FF)),        # f1_b
        per_layer((FF, D)),        # f2_w_t
        per_layer((1, D)),         # f2_b
        per_layer((1, D)),         # ln2_g
        per_layer((1, D)),         # ln2_b
        const2d((D, OUT)),         # fc_w_t
        const2d((1, OUT)),         # fc_b
    ]

    inputs = (
        x,
        kp["w_emb_t"], kp["b_emb"],
        kp["w_sa"], kp["b_sa"],
        kp["ln1_g"], kp["ln1_b"],
        kp["f1_w_t"], kp["f1_b"], kp["f2_w_t"], kp["f2_b"],
        kp["ln2_g"], kp["ln2_b"],
        kp["fc_w_t"], kp["fc_b"],
    )

    return pl.pallas_call(
        transformer_kernel,
        out_shape=jax.ShapeDtypeStruct((B, OUT), jnp.float32),
        grid_spec=pltpu.PrefetchScalarGridSpec(
            num_scalar_prefetch=0,
            grid=(L,),
            in_specs=in_specs,
            out_specs=pl.BlockSpec((B, OUT), lambda l: (0, 0)),
            scratch_shapes=[pltpu.VMEM((B, D), jnp.float32)],
        ),
        compiler_params=pltpu.CompilerParams(
            dimension_semantics=("arbitrary",),
            vmem_limit_bytes=8 * 1024 * 1024,
        ),
    )(*inputs)


# ------------------------------ parameter creation --------------------------------
def init_params(key):
    def nrm(k, shape, scale=0.05):
        return (scale * jax.random.normal(k, shape)).astype(jnp.float32)

    ks = jax.random.split(key, 20)
    L, D, FF = NUM_LAYERS, D_MODEL, DIM_FF
    params = {
        "w_emb": nrm(ks[0], (D, INPUT_DIM)),
        "b_emb": nrm(ks[1], (1, D)),
        # in_proj packed as (L, 3, D, D) / (L, 3, 1, D)  (q, k, v order, as in PyTorch MHA)
        "in_w": nrm(ks[2], (L, 3, D, D)),
        "in_b": nrm(ks[3], (L, 3, 1, D)),
        "out_w": nrm(ks[4], (L, D, D)),
        "out_b": nrm(ks[5], (L, 1, D)),
        "ln1_g": jnp.ones((L, 1, D), jnp.float32),
        "ln1_b": jnp.zeros((L, 1, D), jnp.float32),
        "f1_w": nrm(ks[6], (L, FF, D)),
        "f1_b": nrm(ks[7], (L, 1, FF)),
        "f2_w": nrm(ks[8], (L, D, FF)),
        "f2_b": nrm(ks[9], (L, 1, D)),
        "ln2_g": jnp.ones((L, 1, D), jnp.float32),
        "ln2_b": jnp.zeros((L, 1, D), jnp.float32),
        "fc_w": nrm(ks[10], (OUTPUT_DIM, D)),
        "fc_b": nrm(ks[11], (1, OUTPUT_DIM)),
    }
    return params


# ------------------------------ pure-JAX reference ---------------------------------
def reference_forward(x, params):
    """Full f32 multi-head attention (explicit softmax over the length-1 sequence)."""
    def ln(y, g, b):
        mu = jnp.mean(y, axis=-1, keepdims=True)
        var = jnp.mean((y - mu) ** 2, axis=-1, keepdims=True)
        return (y - mu) / jnp.sqrt(var + LN_EPS) * g + b

    B = x.shape[0]
    h = x @ params["w_emb"].T + params["b_emb"][0]
    dh = D_MODEL // NHEAD
    for l in range(NUM_LAYERS):
        wq, wk, wv = params["in_w"][l]
        bq, bk, bv = params["in_b"][l][:, 0]
        q = (h @ wq.T + bq).reshape(B, NHEAD, dh)
        k = (h @ wk.T + bk).reshape(B, NHEAD, dh)
        v = (h @ wv.T + bv).reshape(B, NHEAD, dh)
        scores = jnp.sum(q * k, axis=-1, keepdims=True) / jnp.sqrt(float(dh))  # (B, H, 1)
        attn = jax.nn.softmax(scores, axis=-1)                                  # == 1.0
        ctx = (attn * v).reshape(B, D_MODEL)
        sa = ctx @ params["out_w"][l].T + params["out_b"][l][0]
        h = ln(h + sa, params["ln1_g"][l][0], params["ln1_b"][l][0])
        ff = jnp.maximum(h @ params["f1_w"][l].T + params["f1_b"][l][0], 0.0)
        ff = ff @ params["f2_w"][l].T + params["f2_b"][l][0]
        h = ln(h + ff, params["ln2_g"][l][0], params["ln2_b"][l][0])
    return h @ params["fc_w"].T + params["fc_b"][0]


# --------------------------------------- main --------------------------------------
if __name__ == "__main__":
    key = jax.random.PRNGKey(0)
    pkey, xkey = jax.random.split(key)
    params = init_params(pkey)
    x = jax.random.normal(xkey, (BATCH, INPUT_DIM), dtype=jnp.float32)

    kernel_params = prepare_kernel_params(params)      # one-time host-side prep
    out = transformer_forward(x, kernel_params)
    out = jax.block_until_ready(out)

    ref = jax.block_until_ready(reference_forward(x, params))
    assert out.shape == (BATCH, OUTPUT_DIM), out.shape
    assert np.all(np.isfinite(np.asarray(out)))
    # Tolerance accounts for bf16 weight storage (f32 accumulation) vs f32 reference.
    np.testing.assert_allclose(np.asarray(out), np.asarray(ref), rtol=5e-2, atol=5e-2)

    print("KERNEL_OK")
</pallas_src>

<mosaic_0001>
module attributes {stable_mosaic.version = 11 : i64} {
  func.func @transformer_kernel(%arg0: i32, %arg1: memref<8x16xf32, #tpu.memory_space<vmem>>, %arg2: memref<16x32xf32, #tpu.memory_space<vmem>>, %arg3: memref<1x32xf32, #tpu.memory_space<vmem>>, %arg4: memref<1x32x32xbf16, #tpu.memory_space<vmem>>, %arg5: memref<1x1x32xf32, #tpu.memory_space<vmem>>, %arg6: memref<1x1x32xf32, #tpu.memory_space<vmem>>, %arg7: memref<1x1x32xf32, #tpu.memory_space<vmem>>, %arg8: memref<1x32x2048xbf16, #tpu.memory_space<vmem>>, %arg9: memref<1x1x2048xf32, #tpu.memory_space<vmem>>, %arg10: memref<1x2048x32xbf16, #tpu.memory_space<vmem>>, %arg11: memref<1x1x32xf32, #tpu.memory_space<vmem>>, %arg12: memref<1x1x32xf32, #tpu.memory_space<vmem>>, %arg13: memref<1x1x32xf32, #tpu.memory_space<vmem>>, %arg14: memref<32x1xf32, #tpu.memory_space<vmem>>, %arg15: memref<1x1xf32, #tpu.memory_space<vmem>>, %arg16: memref<8x1xf32, #tpu.memory_space<vmem>>, %arg17: memref<8x32xf32, #tpu.memory_space<vmem>>) attributes {dimension_semantics = [#tpu.dimension_semantics<arbitrary>], iteration_bounds = array<i64: 2>, scalar_prefetch = 0 : i64, scratch_operands = 1 : i64, tpu.core_type = #tpu.core_type<tc>, window_params = [{pipeline_mode = #tpu.pipeline_mode<synchronous>, transform_indices = @transform_0, window_bounds = array<i64: 8, 16>}, {pipeline_mode = #tpu.pipeline_mode<synchronous>, transform_indices = @transform_1, window_bounds = array<i64: 16, 32>}, {pipeline_mode = #tpu.pipeline_mode<synchronous>, transform_indices = @transform_2, window_bounds = array<i64: 1, 32>}, {transform_indices = @transform_3, window_bounds = array<i64: 1, 32, 32>}, {transform_indices = @transform_4, window_bounds = array<i64: 1, 1, 32>}, {transform_indices = @transform_5, window_bounds = array<i64: 1, 1, 32>}, {transform_indices = @transform_6, window_bounds = array<i64: 1, 1, 32>}, {transform_indices = @transform_7, window_bounds = array<i64: 1, 32, 2048>}, {transform_indices = @transform_8, window_bounds = array<i64: 1, 1, 2048>}, {transform_indices = @transform_9, window_bounds = array<i64: 1, 2048, 32>}, {transform_indices = @transform_10, window_bounds = array<i64: 1, 1, 32>}, {transform_indices = @transform_11, window_bounds = array<i64: 1, 1, 32>}, {transform_indices = @transform_12, window_bounds = array<i64: 1, 1, 32>}, {pipeline_mode = #tpu.pipeline_mode<synchronous>, transform_indices = @transform_13, window_bounds = array<i64: 32, 1>}, {pipeline_mode = #tpu.pipeline_mode<synchronous>, transform_indices = @transform_14, window_bounds = array<i64: 1, 1>}, {pipeline_mode = #tpu.pipeline_mode<synchronous>, transform_indices = @transform_15, window_bounds = array<i64: 8, 1>}]} {
    %c0_i32 = arith.constant 0 : i32
    %0 = arith.cmpi eq, %arg0, %c0_i32 : i32
    %1 = arith.extui %0 : i1 to i32
    %c0_i32_0 = arith.constant 0 : i32
    %2 = arith.cmpi ne, %1, %c0_i32_0 : i32
    scf.if %2 {
      %c0_48 = arith.constant 0 : index
      %c0_49 = arith.constant 0 : index
      %88 = vector.load %arg1[%c0_48, %c0_49] : memref<8x16xf32, #tpu.memory_space<vmem>>, vector<8x16xf32>
      %c0_50 = arith.constant 0 : index
      %c0_51 = arith.constant 0 : index
      %89 = vector.load %arg2[%c0_50, %c0_51] : memref<16x32xf32, #tpu.memory_space<vmem>>, vector<16x32xf32>
      %cst_52 = arith.constant dense<0.000000e+00> : vector<8x32xf32>
      %90 = tpu.matmul %88, %89, %cst_52 {dimension_numbers = #tpu.dot_dimension_numbers<[1], [0], [0], [1], [0, 0, 1, 1], [], []>} : vector<8x16xf32>, vector<16x32xf32>, vector<8x32xf32> -> vector<8x32xf32>
      %c0_53 = arith.constant 0 : index
      %c0_54 = arith.constant 0 : index
      %91 = vector.load %arg3[%c0_53, %c0_54] : memref<1x32xf32, #tpu.memory_space<vmem>>, vector<1x32xf32>
      %92 = vector.broadcast %91 : vector<1x32xf32> to vector<8x32xf32>
      %93 = arith.addf %90, %92 : vector<8x32xf32>
      %c0_55 = arith.constant 0 : index
      %c0_56 = arith.constant 0 : index
      %94 = vector.load %arg17[%c0_55, %c0_56] : memref<8x32xf32, #tpu.memory_space<vmem>>, vector<8x32xf32>
      tpu.vector_store %arg17[%c0_55, %c0_56], %93 {strides = array<i32>} : memref<8x32xf32, #tpu.memory_space<vmem>>, vector<8x32xf32>,
    } else {
    }
    %c0 = arith.constant 0 : index
    %c0_1 = arith.constant 0 : index
    %3 = vector.load %arg17[%c0, %c0_1] : memref<8x32xf32, #tpu.memory_space<vmem>>, vector<8x32xf32>
    %4 = arith.truncf %3 : vector<8x32xf32> to vector<8x32xbf16>
    %c0_2 = arith.constant 0 : index
    %c0_3 = arith.constant 0 : index
    %c0_4 = arith.constant 0 : index
    %5 = vector.load %arg4[%c0_2, %c0_3, %c0_4] : memref<1x32x32xbf16, #tpu.memory_space<vmem>>, vector<1x32x32xbf16>
    %6 = vector.shape_cast %5 : vector<1x32x32xbf16> to vector<32x32xbf16>
    %cst = arith.constant dense<0.000000e+00> : vector<8x32xf32>
    %7 = tpu.matmul %4, %6, %cst {dimension_numbers = #tpu.dot_dimension_numbers<[1], [0], [0], [1], [0, 0, 1, 1], [], []>} : vector<8x32xbf16>, vector<32x32xbf16>, vector<8x32xf32> -> vector<8x32xf32>
    %c0_5 = arith.constant 0 : index
    %c0_6 = arith.constant 0 : index
    %c0_7 = arith.constant 0 : index
    %8 = vector.load %arg5[%c0_5, %c0_6, %c0_7] : memref<1x1x32xf32, #tpu.memory_space<vmem>>, vector<1x1x32xf32>
    %9 = vector.shape_cast %8 : vector<1x1x32xf32> to vector<1x32xf32>
    %10 = vector.broadcast %9 : vector<1x32xf32> to vector<8x32xf32>
    %11 = arith.addf %7, %10 : vector<8x32xf32>
    %12 = arith.addf %3, %11 : vector<8x32xf32>
    %c0_8 = arith.constant 0 : index
    %c0_9 = arith.constant 0 : index
    %c0_10 = arith.constant 0 : index
    %13 = vector.load %arg6[%c0_8, %c0_9, %c0_10] : memref<1x1x32xf32, #tpu.memory_space<vmem>>, vector<1x1x32xf32>
    %14 = vector.shape_cast %13 : vector<1x1x32xf32> to vector<1x32xf32>
    %c0_11 = arith.constant 0 : index
    %c0_12 = arith.constant 0 : index
    %c0_13 = arith.constant 0 : index
    %15 = vector.load %arg7[%c0_11, %c0_12, %c0_13] : memref<1x1x32xf32, #tpu.memory_space<vmem>>, vector<1x1x32xf32>
    %16 = vector.shape_cast %15 : vector<1x1x32xf32> to vector<1x32xf32>
    %cst_14 = arith.constant dense<0.000000e+00> : vector<8xf32>
    %17 = vector.multi_reduction <add>, %12, %cst_14 [1] : vector<8x32xf32> to vector<8xf32>
    %18 = vector.shape_cast %17 : vector<8xf32> to vector<8x1xf32>
    %cst_15 = arith.constant 3.200000e+01 : f32
    %19 = vector.broadcast %cst_15 : f32 to vector<8x1xf32>
    %20 = arith.divf %18, %19 : vector<8x1xf32>
    %21 = vector.broadcast %20 : vector<8x1xf32> to vector<8x32xf32>
    %22 = arith.subf %12, %21 : vector<8x32xf32>
    %23 = arith.mulf %22, %22 : vector<8x32xf32>
    %cst_16 = arith.constant dense<0.000000e+00> : vector<8xf32>
    %24 = vector.multi_reduction <add>, %23, %cst_16 [1] : vector<8x32xf32> to vector<8xf32>
    %25 = vector.shape_cast %24 : vector<8xf32> to vector<8x1xf32>
    %cst_17 = arith.constant 3.200000e+01 : f32
    %26 = vector.broadcast %cst_17 : f32 to vector<8x1xf32>
    %27 = arith.divf %25, %26 : vector<8x1xf32>
    %28 = vector.broadcast %20 : vector<8x1xf32> to vector<8x32xf32>
    %29 = arith.subf %12, %28 : vector<8x32xf32>
    %cst_18 = arith.constant 9.99999974E-6 : f32
    %30 = vector.broadcast %cst_18 : f32 to vector<8x1xf32>
    %31 = arith.addf %27, %30 : vector<8x1xf32>
    %32 = math.rsqrt %31 : vector<8x1xf32>
    %33 = vector.broadcast %32 : vector<8x1xf32> to vector<8x32xf32>
    %34 = arith.mulf %29, %33 : vector<8x32xf32>
    %35 = vector.broadcast %14 : vector<1x32xf32> to vector<8x32xf32>
    %36 = arith.mulf %34, %35 : vector<8x32xf32>
    %37 = vector.broadcast %16 : vector<1x32xf32> to vector<8x32xf32>
    %38 = arith.addf %36, %37 : vector<8x32xf32>
    %39 = arith.truncf %38 : vector<8x32xf32> to vector<8x32xbf16>
    %c0_19 = arith.constant 0 : index
    %c0_20 = arith.constant 0 : index
    %c0_21 = arith.constant 0 : index
    %40 = vector.load %arg8[%c0_19, %c0_20, %c0_21] : memref<1x32x2048xbf16, #tpu.memory_space<vmem>>, vector<1x32x2048xbf16>
    %41 = vector.shape_cast %40 : vector<1x32x2048xbf16> to vector<32x2048xbf16>
    %cst_22 = arith.constant dense<0.000000e+00> : vector<8x2048xf32>
    %42 = tpu.matmul %39, %41, %cst_22 {dimension_numbers = #tpu.dot_dimension_numbers<[1], [0], [0], [1], [0, 0, 1, 1], [], []>} : vector<8x32xbf16>, vector<32x2048xbf16>, vector<8x2048xf32> -> vector<8x2048xf32>
    %c0_23 = arith.constant 0 : index
    %c0_24 = arith.constant 0 : index
    %c0_25 = arith.constant 0 : index
    %43 = vector.load %arg9[%c0_23, %c0_24, %c0_25] : memref<1x1x2048xf32, #tpu.memory_space<vmem>>, vector<1x1x2048xf32>
    %44 = vector.shape_cast %43 : vector<1x1x2048xf32> to vector<1x2048xf32>
    %45 = vector.broadcast %44 : vector<1x2048xf32> to vector<8x2048xf32>
    %46 = arith.addf %42, %45 : vector<8x2048xf32>
    %cst_26 = arith.constant 0.000000e+00 : f32
    %47 = vector.broadcast %cst_26 : f32 to vector<8x2048xf32>
    %48 = arith.maximumf %46, %47 : vector<8x2048xf32>
    %49 = arith.truncf %48 : vector<8x2048xf32> to vector<8x2048xbf16>
    %c0_27 = arith.constant 0 : index
    %c0_28 = arith.constant 0 : index
    %c0_29 = arith.constant 0 : index
    %50 = vector.load %arg10[%c0_27, %c0_28, %c0_29] : memref<1x2048x32xbf16, #tpu.memory_space<vmem>>, vector<1x2048x32xbf16>
    %51 = vector.shape_cast %50 : vector<1x2048x32xbf16> to vector<2048x32xbf16>
    %cst_30 = arith.constant dense<0.000000e+00> : vector<8x32xf32>
    %52 = tpu.matmul %49, %51, %cst_30 {dimension_numbers = #tpu.dot_dimension_numbers<[1], [0], [0], [1], [0, 0, 1, 1], [], []>} : vector<8x2048xbf16>, vector<2048x32xbf16>, vector<8x32xf32> -> vector<8x32xf32>
    %c0_31 = arith.constant 0 : index
    %c0_32 = arith.constant 0 : index
    %c0_33 = arith.constant 0 : index
    %53 = vector.load %arg11[%c0_31, %c0_32, %c0_33] : memref<1x1x32xf32, #tpu.memory_space<vmem>>, vector<1x1x32xf32>
    %54 = vector.shape_cast %53 : vector<1x1x32xf32> to vector<1x32xf32>
    %55 = vector.broadcast %54 : vector<1x32xf32> to vector<8x32xf32>
    %56 = arith.addf %52, %55 : vector<8x32xf32>
    %57 = arith.addf %38, %56 : vector<8x32xf32>
    %c0_34 = arith.constant 0 : index
    %c0_35 = arith.constant 0 : index
    %c0_36 = arith.constant 0 : index
    %58 = vector.load %arg12[%c0_34, %c0_35, %c0_36] : memref<1x1x32xf32, #tpu.memory_space<vmem>>, vector<1x1x32xf32>
    %59 = vector.shape_cast %58 : vector<1x1x32xf32> to vector<1x32xf32>
    %c0_37 = arith.constant 0 : index
    %c0_38 = arith.constant 0 : index
    %c0_39 = arith.constant 0 : index
    %60 = vector.load %arg13[%c0_37, %c0_38, %c0_39] : memref<1x1x32xf32, #tpu.memory_space<vmem>>, vector<1x1x32xf32>
    %61 = vector.shape_cast %60 : vector<1x1x32xf32> to vector<1x32xf32>
    %cst_40 = arith.constant dense<0.000000e+00> : vector<8xf32>
    %62 = vector.multi_reduction <add>, %57, %cst_40 [1] : vector<8x32xf32> to vector<8xf32>
    %63 = vector.shape_cast %62 : vector<8xf32> to vector<8x1xf32>
    %cst_41 = arith.constant 3.200000e+01 : f32
    %64 = vector.broadcast %cst_41 : f32 to vector<8x1xf32>
    %65 = arith.divf %63, %64 : vector<8x1xf32>
    %66 = vector.broadcast %65 : vector<8x1xf32> to vector<8x32xf32>
    %67 = arith.subf %57, %66 : vector<8x32xf32>
    %68 = arith.mulf %67, %67 : vector<8x32xf32>
    %cst_42 = arith.constant dense<0.000000e+00> : vector<8xf32>
    %69 = vector.multi_reduction <add>, %68, %cst_42 [1] : vector<8x32xf32> to vector<8xf32>
    %70 = vector.shape_cast %69 : vector<8xf32> to vector<8x1xf32>
    %cst_43 = arith.constant 3.200000e+01 : f32
    %71 = vector.broadcast %cst_43 : f32 to vector<8x1xf32>
    %72 = arith.divf %70, %71 : vector<8x1xf32>
    %73 = vector.broadcast %65 : vector<8x1xf32> to vector<8x32xf32>
    %74 = arith.subf %57, %73 : vector<8x32xf32>
    %cst_44 = arith.constant 9.99999974E-6 : f32
    %75 = vector.broadcast %cst_44 : f32 to vector<8x1xf32>
    %76 = arith.addf %72, %75 : vector<8x1xf32>
    %77 = math.rsqrt %76 : vector<8x1xf32>
    %78 = vector.broadcast %77 : vector<8x1xf32> to vector<8x32xf32>
    %79 = arith.mulf %74, %78 : vector<8x32xf32>
    %80 = vector.broadcast %59 : vector<1x32xf32> to vector<8x32xf32>
    %81 = arith.mulf %79, %80 : vector<8x32xf32>
    %82 = vector.broadcast %61 : vector<1x32xf32> to vector<8x32xf32>
    %83 = arith.addf %81, %82 : vector<8x32xf32>
    %c0_45 = arith.constant 0 : index
    %c0_46 = arith.constant 0 : index
    %84 = vector.load %arg17[%c0_45, %c0_46] : memref<8x32xf32, #tpu.memory_space<vmem>>, vector<8x32xf32>
    tpu.vector_store %arg17[%c0_45, %c0_46], %83 {strides = array<i32>} : memref<8x32xf32, #tpu.memory_space<vmem>>, vector<8x32xf32>,
    %c1_i32 = arith.constant 1 : i32
    %85 = arith.cmpi eq, %arg0, %c1_i32 : i32
    %86 = arith.extui %85 : i1 to i32
    %c0_i32_47 = arith.constant 0 : i32
    %87 = arith.cmpi ne, %86, %c0_i32_47 : i32
    scf.if %87 {
      %c0_48 = arith.constant 0 : index
      %c0_49 = arith.constant 0 : index
      %88 = vector.load %arg14[%c0_48, %c0_49] : memref<32x1xf32, #tpu.memory_space<vmem>>, vector<32x1xf32>
      %cst_50 = arith.constant dense<0.000000e+00> : vector<8x1xf32>
      %89 = tpu.matmul %83, %88, %cst_50 {dimension_numbers = #tpu.dot_dimension_numbers<[1], [0], [0], [1], [0, 0, 1, 1], [], []>} : vector<8x32xf32>, vector<32x1xf32>, vector<8x1xf32> -> vector<8x1xf32>
      %c0_51 = arith.constant 0 : index
      %c0_52 = arith.constant 0 : index
      %90 = vector.load %arg15[%c0_51, %c0_52] : memref<1x1xf32, #tpu.memory_space<vmem>>, vector<1x1xf32>
      %91 = vector.broadcast %90 : vector<1x1xf32> to vector<8x1xf32>
      %92 = arith.addf %89, %91 : vector<8x1xf32>
      %c0_53 = arith.constant 0 : index
      %c0_54 = arith.constant 0 : index
      %93 = vector.load %arg16[%c0_53, %c0_54] : memref<8x1xf32, #tpu.memory_space<vmem>>, vector<8x1xf32>
      tpu.vector_store %arg16[%c0_53, %c0_54], %92 {strides = array<i32>} : memref<8x1xf32, #tpu.memory_space<vmem>>, vector<8x1xf32>,
    } else {
    }
    return
  }
  func.func @transform_0(%arg0: i32) -> (i32, i32) {
    %c0_i32 = arith.constant 0 : i32
    %c0_i32_0 = arith.constant 0 : i32
    %c0_i32_1 = arith.constant 0 : i32
    return %c0_i32, %c0_i32_0 : i32, i32
  }
  func.func @transform_1(%arg0: i32) -> (i32, i32) {
    %c0_i32 = arith.constant 0 : i32
    %c0_i32_0 = arith.constant 0 : i32
    %c0_i32_1 = arith.constant 0 : i32
    return %c0_i32, %c0_i32_0 : i32, i32
  }
  func.func @transform_2(%arg0: i32) -> (i32, i32) {
    %c0_i32 = arith.constant 0 : i32
    %c0_i32_0 = arith.constant 0 : i32
    %c0_i32_1 = arith.constant 0 : i32
    return %c0_i32, %c0_i32_0 : i32, i32
  }
  func.func @transform_3(%arg0: i32) -> (i32, i32, i32) {
    %c0_i32 = arith.constant 0 : i32
    %c0_i32_0 = arith.constant 0 : i32
    %c0_i32_1 = arith.constant 0 : i32
    return %arg0, %c0_i32, %c0_i32_0 : i32, i32, i32
  }
  func.func @transform_4(%arg0: i32) -> (i32, i32, i32) {
    %c0_i32 = arith.constant 0 : i32
    %c0_i32_0 = arith.constant 0 : i32
    %c0_i32_1 = arith.constant 0 : i32
    return %arg0, %c0_i32, %c0_i32_0 : i32, i32, i32
  }
  func.func @transform_5(%arg0: i32) -> (i32, i32, i32) {
    %c0_i32 = arith.constant 0 : i32
    %c0_i32_0 = arith.constant 0 : i32
    %c0_i32_1 = arith.constant 0 : i32
    return %arg0, %c0_i32, %c0_i32_0 : i32, i32, i32
  }
  func.func @transform_6(%arg0: i32) -> (i32, i32, i32) {
    %c0_i32 = arith.constant 0 : i32
    %c0_i32_0 = arith.constant 0 : i32
    %c0_i32_1 = arith.constant 0 : i32
    return %arg0, %c0_i32, %c0_i32_0 : i32, i32, i32
  }
  func.func @transform_7(%arg0: i32) -> (i32, i32, i32) {
    %c0_i32 = arith.constant 0 : i32
    %c0_i32_0 = arith.constant 0 : i32
    %c0_i32_1 = arith.constant 0 : i32
    return %arg0, %c0_i32, %c0_i32_0 : i32, i32, i32
  }
  func.func @transform_8(%arg0: i32) -> (i32, i32, i32) {
    %c0_i32 = arith.constant 0 : i32
    %c0_i32_0 = arith.constant 0 : i32
    %c0_i32_1 = arith.constant 0 : i32
    return %arg0, %c0_i32, %c0_i32_0 : i32, i32, i32
  }
  func.func @transform_9(%arg0: i32) -> (i32, i32, i32) {
    %c0_i32 = arith.constant 0 : i32
    %c0_i32_0 = arith.constant 0 : i32
    %c0_i32_1 = arith.constant 0 : i32
    return %arg0, %c0_i32, %c0_i32_0 : i32, i32, i32
  }
  func.func @transform_10(%arg0: i32) -> (i32, i32, i32) {
    %c0_i32 = arith.constant 0 : i32
    %c0_i32_0 = arith.constant 0 : i32
    %c0_i32_1 = arith.constant 0 : i32
    return %arg0, %c0_i32, %c0_i32_0 : i32, i32, i32
  }
  func.func @transform_11(%arg0: i32) -> (i32, i32, i32) {
    %c0_i32 = arith.constant 0 : i32
    %c0_i32_0 = arith.constant 0 : i32
    %c0_i32_1 = arith.constant 0 : i32
    return %arg0, %c0_i32, %c0_i32_0 : i32, i32, i32
  }
  func.func @transform_12(%arg0: i32) -> (i32, i32, i32) {
    %c0_i32 = arith.constant 0 : i32
    %c0_i32_0 = arith.constant 0 : i32
    %c0_i32_1 = arith.constant 0 : i32
    return %arg0, %c0_i32, %c0_i32_0 : i32, i32, i32
  }
  func.func @transform_13(%arg0: i32) -> (i32, i32) {
    %c0_i32 = arith.constant 0 : i32
    %c0_i32_0 = arith.constant 0 : i32
    %c0_i32_1 = arith.constant 0 : i32
    return %c0_i32, %c0_i32_0 : i32, i32
  }
  func.func @transform_14(%arg0: i32) -> (i32, i32) {
    %c0_i32 = arith.constant 0 : i32
    %c0_i32_0 = arith.constant 0 : i32
    %c0_i32_1 = arith.constant 0 : i32
    return %c0_i32, %c0_i32_0 : i32, i32
  }
  func.func @transform_15(%arg0: i32) -> (i32, i32) {
    %c0_i32 = arith.constant 0 : i32
    %c0_i32_0 = arith.constant 0 : i32
    %c0_i32_1 = arith.constant 0 : i32
    return %c0_i32, %c0_i32_0 : i32, i32
  }
}

</mosaic_0001>

<bundles_post_ra>
// kernel: transformer_forward.1
= control target key start
LH: loop header
LB: loop body
LE: loop exit
PB: predicated region body
PF: predicated region fallthrough
CT: control target
= control target key end

     0   :  { %s3599_s20 = smov 0   ;;  %s3991_s0 = inlined_call_operand.vmem [shape: f32[8,16], index: 0, kind: input, shape index: {}]   ;;  %s3992_s1 = inlined_call_operand.vmem [shape: f32[16,32], index: 1, kind: input, shape index: {}]   ;;  %s3993_s2 = inlined_call_operand.vmem [shape: f32[1,32], index: 2, kind: input, shape index: {}]   ;;  %s3994_s3 = inlined_call_operand.vmem [shape: bf16[2,32,32], index: 3, kind: input, shape index: {}]   ;;  %s3995_s4 = inlined_call_operand.vmem [shape: f32[2,1,32], index: 4, kind: input, shape index: {}]   ;;  %s3996_s5 = inlined_call_operand.vmem [shape: f32[2,1,32], index: 5, kind: input, shape index: {}]   ;;  %s3997_s6 = inlined_call_operand.vmem [shape: f32[2,1,32], index: 6, kind: input, shape index: {}]   ;;  %s3998_s7 = inlined_call_operand.vmem [shape: bf16[2,32,2048], index: 7, kind: input, shape index: {}]   ;;  %s3999_s8 = inlined_call_operand.vmem [shape: f32[2,1,2048], index: 8, kind: input, shape index: {}]   ;;  %s4000_s9 = inlined_call_operand.vmem [shape: bf16[2,2048,32], index: 9, kind: input, shape index: {}]   ;;  %s4001_s10 = inlined_call_operand.vmem [shape: f32[2,1,32], index: 10, kind: input, shape index: {}]   ;;  %s4002_s11 = inlined_call_operand.vmem [shape: f32[2,1,32], index: 11, kind: input, shape index: {}]   ;;  %s4003_s12 = inlined_call_operand.vmem [shape: f32[2,1,32], index: 12, kind: input, shape index: {}]   ;;  %s4004_s13 = inlined_call_operand.vmem [shape: f32[32,1], index: 13, kind: input, shape index: {}]   ;;  %s4005_s14 = inlined_call_operand.<no memory space> [shape: f32[1,1], index: 14, kind: input, shape index: {}]   ;;  %s4006_s15 = inlined_call_operand.vmem [shape: f32[8,1], index: 15, kind: output, shape index: {}]  }
   0x1   :  { %4009 = sst [smem:[#allocation5_spill]] %s3993_s2  ;;  %v20_v0 = vstv %s4005_s14 }
   0x2   :  { %4010 = sst [smem:[#allocation6_spill]] %s3994_s3  ;;  %21 = vst [vmem:[#allocation3] sm:$0x1] %v20_v0 }
   0x3   :  { %4011 = sst [smem:[#allocation7_spill]] %s4004_s13 }
   0x4   :  { %4012 = sst [smem:[#allocation8_spill]] %s4006_s15 }
   0x5 LB: > { %4013 = sst [smem:[#allocation4_spill]] %s3513_s20  ;;  %s3605_s21 = sadd.s32 4294967295, %s3513_s20   ;;  %s3513_s20 = sphi %s3599_s20, %s27_s20  }
   0x6   : > { %p2640_p0 = scmp.ge.s32.totalorder %s3513_s20, 1  ;;  %p511_p1 = scmp.lt.s32.totalorder %s3513_s20, 3 }
   0x8   : > { %p512_p2 = pnand %p2640_p0, %p511_p1 }
   0x9   : > { %p586_p3 = scmp.lt.s32.totalorder (!%p512_p2), %s3605_s21, 1  ;;  %s4014_s3 = sld [smem:[#allocation6_spill]] (!%p512_p2) }
   0xa   : > { %515 = sbr.rel (%p512_p2) target bundleno = 1317 (0x525), region = 80  ;;  %p2648_p4 = scmp.ne.s32.totalorder (!%p512_p2), %s3605_s21, 0 }
   0xf   : > { %s3611_s14 = scalar_select %p586_p3, %s3605_s21, 1 }
  0x10   : > { %s4015_s18 = sld [smem:[#allocation5_spill]] (!%p2648_p4) }
  0x11   : > { %s3319_s22 = sshll.u32 %s3611_s14, 4  ;;  %s3320_s20 = sshll.u32 %s3611_s14, 8 }
  0x12   : > { %s590_s28 = scalar_lea.vmem %s4014_s3, %s3319_s22  ;;  %s3633_s2 = scalar_lea.vmem %s3998_s7, %s3320_s20 }
  0x13   : > { %s3638_s25 = scalar_lea.vmem %s3999_s8, %s3319_s22  ;;  %s3321_s26 = sshll.u32 %s3611_s14, 10 }
  0x14   : > { %s616_s29 = scalar_lea.vmem %s4001_s10, %s3611_s14  ;;  %s3648_s17 = scalar_lea.vmem %s4000_s9, %s3321_s26 }
  0x15   : > { %s619_s13 = scalar_lea.vmem %s4002_s11, %s3611_s14  ;;  %s622_s23 = scalar_lea.vmem %s4003_s12, %s3611_s14 }
  0x16   : > { %627 = sbr.rel (%p2648_p4) target bundleno = 160 (0xa0), region = 84 }
  0x1b   : > { %v630_v1 = vld [vmem:[%s3992_s1 + $0x8] sm:$0xff]  ;;  %v629_v2 = vld [vmem:[%s3992_s1] sm:$0xff]  ;;  %vm635_vm0 = vcmask 130048   ;;  %vm659_vm1 = vcmask 261120  }
  0x1c   : > { %653 = vmatpush.msra.mxu0 %v630_v1  ;;  %v628_v3 = vld [vmem:[%s3991_s0] sm:$0xff] }
  0x1d   : > { %v3493_v4 = vld [vmem:[%s4015_s18] ss:$0 sm:$0xff] }
  0x1e   : > { %654 = vmatpush.msra.mxu0 %v629_v2 }
  0x1f   : > { %2649 = vmatmul.msk.f32.vlgmr.msra.gmra.mxu0 %vm635_vm0, %v628_v3 }
  0x9c   : > { %v656_v5 = vpop.f32.mrf.mxu0 }
  0x9d   : > { %v657_v6 = vadd.f32 %v3493_v4, %v656_v5 }
  0x9f   : > { %660 = vst.msk [vmem:[#allocation2] sm:$0xff] %vm659_vm1, %v657_v6 }
  0xa0 PF: > { %v3323_v7 = vld [vmem:[%s590_s28 + $0x8] sm:$0xff]  ;;  %v3322_v8 = vld [vmem:[%s590_s28] sm:$0xff]  ;;  %vm683_vm2 = vcmask 261120   ;;  %s4016_s22 = scalar_lea.vmem %s3995_s4, %s3611_s14  ;;  %v3515_v17 = vmov 32.0   ;;  %v2741_v54 = vld [vmem:[%s3633_s2 + $0x90] sm:$0xf]  ;;  %s4017_s3 = scalar_lea.vmem %s3996_s5, %s3611_s14 }
  0xa1   : > { %693 = vmatpush.bf16.msra.mxu0 %v3323_v7  ;;  %v3494_v11 = vld [vmem:[%s4016_s22] ss:$0 sm:$0xff]  ;;  %3500 = vrcp.f32 %v3515_v17  ;;  %v3340_v31 = vld [vmem:[%s3633_s2 + $0x84] sm:$0xf]  ;;  %v2733_v34 = vld [vmem:[%s3633_s2 + $0x88] sm:$0xf]  ;;  %s4018_s26 = scalar_lea.vmem %s3997_s6, %s3611_s14 }
  0xa2   : > { %v2725_v29 = vld [vmem:[%s3633_s2 + $0x80] sm:$0xf]  ;;  %v2727_v33 = vld [vmem:[%s3633_s2 + $0xc0] sm:$0xf0]  ;;  %v3349_v35 = vld [vmem:[%s3633_s2 + $0xc4] sm:$0xf0] }
  0xa3   : > { %v3348_v30 = vld [vmem:[%s3633_s2 + $0xbc] sm:$0xf0]  ;;  %v2730_v36 = vor.u32 %v3340_v31, %v2727_v33  ;;  %v2734_v37 = vor.u32 %v3349_v35, %v2733_v34  ;;  %v3341_v38 = vld [vmem:[%s3633_s2 + $0x8c] sm:$0xf]  ;;  %v3324_v43 = vld [vmem:[%s3633_s2 + $0x4] sm:$0xf] }
  0xa4   : > { %v2726_v32 = vor.u32 %v3348_v30, %v2725_v29  ;;  %v2735_v39 = vld [vmem:[%s3633_s2 + $0xc8] sm:$0xf0]  ;;  %v2661_v41 = vld [vmem:[%s3633_s2] sm:$0xf]  ;;  %v2663_v45 = vld [vmem:[%s3633_s2 + $0x40] sm:$0xf0] }
  0xa5   : > { %694 = vmatpush.bf16.msra.mxu0 %v3322_v8  ;;  %v2738_v40 = vor.u32 %v3341_v38, %v2735_v39  ;;  %991 = vmatpush.bf16.msra.mxu2 %v2730_v36  ;;  %v3332_v42 = vld [vmem:[%s3633_s2 + $0x3c] sm:$0xf0]  ;;  %v2669_v46 = vld [vmem:[%s3633_s2 + $0x8] sm:$0xf]  ;;  %v2666_v48 = vor.u32 %v3324_v43, %v2663_v45  ;;  %v3325_v50 = vld [vmem:[%s3633_s2 + $0xc] sm:$0xf] }
  0xa6   : > { %v661_v9 = vld [vmem:[#allocation2] sm:$0xff]  ;;  %978 = vmatpush.bf16.msra.mxu1 %v2726_v32  ;;  %1004 = vmatpush.bf16.msra.mxu3 %v2734_v37  ;;  %v2662_v44 = vor.u32 %v3332_v42, %v2661_v41  ;;  %v3333_v47 = vld [vmem:[%s3633_s2 + $0x44] sm:$0xf0]  ;;  %v2671_v51 = vld [vmem:[%s3633_s2 + $0x48] sm:$0xf0]  ;;  %p3315_p5 = scmp.ne.s32.totalorder %s3605_s21, 1 }
  0xa7   : > { %v662_v10 = vpack.c.bf16 %v661_v9, %v661_v9  ;;  %v3501_v18 = vpop.eup %3500  ;;  %v2670_v49 = vor.u32 %v3333_v47, %v2669_v46  ;;  %v2674_v52 = vor.u32 %v3325_v50, %v2671_v51  ;;  %v3350_v55 = vld [vmem:[%s3633_s2 + $0xcc] sm:$0xf0]  ;;  %v3342_v56 = vld [vmem:[%s3633_s2 + $0x94] sm:$0xf]  ;;  %v2749_v60 = vld [vmem:[%s3633_s2 + $0x98] sm:$0xf] }
  0xa8   : > { %v707_v19 = vmul.f32 32.0, %v3501_v18  ;;  %vm711_vm3 = vweird.f32 %v3501_v18  ;;  %v2742_v58 = vor.u32 %v3350_v55, %v2741_v54  ;;  %v2743_v59 = vld [vmem:[%s3633_s2 + $0xd0] sm:$0xf0]  ;;  %v3351_v61 = vld [vmem:[%s3633_s2 + $0xd4] sm:$0xf0]  ;;  %s4019_s20 = sld [smem:[#allocation7_spill]] (!%p3315_p5) }
  0xa9   : > { %2658 = vmatmul.msk.bf16.vlgmr.msra.gmra.mxu0 %vm683_vm2, %v662_v10  ;;  %992 = vmatpush.bf16.msra.mxu2 %v2666_v48  ;;  %v2746_v62 = vor.u32 %v3342_v56, %v2743_v59  ;;  %v2750_v63 = vor.u32 %v3351_v61, %v2749_v60  ;;  %v3343_v0 = vld [vmem:[%s3633_s2 + $0x9c] sm:$0xf]  ;;  %v2677_v2 = vld [vmem:[%s3633_s2 + $0x10] sm:$0xf]  ;;  %v3326_v6 = vld [vmem:[%s3633_s2 + $0x14] sm:$0xf] }
  0xaa   : > { %v708_v20 = vsub.f32 1.0, %v707_v19  ;;  %1017 = vmatpush.bf16.msrb.mxu0 %v2738_v40  ;;  %979 = vmatpush.bf16.msra.mxu1 %v2662_v44  ;;  %v2751_v1 = vld [vmem:[%s3633_s2 + $0xd8] sm:$0xf0]  ;;  %v3334_v5 = vld [vmem:[%s3633_s2 + $0x4c] sm:$0xf0]  ;;  %s4021_s16 = sld [smem:[#allocation8_spill]] (!%p3315_p5) }
  0xab   : > { %1005 = vmatpush.bf16.msra.mxu3 %v2670_v49  ;;  %v2754_v4 = vor.u32 %v3343_v0, %v2751_v1  ;;  %v2678_v7 = vor.u32 %v3334_v5, %v2677_v2  ;;  %v2679_v8 = vld [vmem:[%s3633_s2 + $0x50] sm:$0xf0]  ;;  %v3335_v10 = vld [vmem:[%s3633_s2 + $0x54] sm:$0xf0]  ;;  %v2757_v29 = vld [vmem:[%s3633_s2 + $0xa0] sm:$0xf] }
  0xac   : > { %v709_v21 = vmul.f32 %v3501_v18, %v708_v20  ;;  %v3352_v30 = vld [vmem:[%s3633_s2 + $0xdc] sm:$0xf0]  ;;  %v3344_v31 = vld [vmem:[%s3633_s2 + $0xa4] sm:$0xf]  ;;  %v2765_v33 = vld [vmem:[%s3633_s2 + $0xa8] sm:$0xf] }
  0xad   : > { %1043 = vmatpush.bf16.msrb.mxu2 %v2746_v62  ;;  %v2759_v32 = vld [vmem:[%s3633_s2 + $0xe0] sm:$0xf0]  ;;  %v3353_v35 = vld [vmem:[%s3633_s2 + $0xe4] sm:$0xf0]  ;;  %v3345_v36 = vld [vmem:[%s3633_s2 + $0xac] sm:$0xf]  ;;  %v2758_v38 = vor.u32 %v3352_v30, %v2757_v29 }
  0xae   : > { %v710_v22 = vadd.f32 %v3501_v18, %v709_v21  ;;  %1018 = vmatpush.bf16.msrb.mxu0 %v2674_v52  ;;  %1030 = vmatpush.bf16.msrb.mxu1 %v2742_v58  ;;  %v2767_v37 = vld [vmem:[%s3633_s2 + $0xe8] sm:$0xf0]  ;;  %v2762_v39 = vor.u32 %v3344_v31, %v2759_v32  ;;  %v2693_v40 = vld [vmem:[%s3633_s2 + $0x20] sm:$0xf]  ;;  %v2766_v42 = vor.u32 %v3353_v35, %v2765_v33  ;;  %v3328_v44 = vld [vmem:[%s3633_s2 + $0x24] sm:$0xf]  ;;  %s4020_s22 = smov (!%p3315_p5), %s4019_s20 }
  0xaf   : > { %1056 = vmatpush.bf16.msrb.mxu3 %v2750_v63  ;;  %v3336_v41 = vld [vmem:[%s3633_s2 + $0x5c] sm:$0xf0]  ;;  %v2770_v43 = vor.u32 %v3345_v36, %v2767_v37  ;;  %v2695_v45 = vld [vmem:[%s3633_s2 + $0x60] sm:$0xf0]  ;;  %v2701_v46 = vld [vmem:[%s3633_s2 + $0x28] sm:$0xf] }
  0xb0   : > { %v3678_v23 = vsel %vm711_vm3, %v3501_v18, %v710_v22  ;;  %v3495_v22 = vld [vmem:[%s4017_s3] ss:$0 sm:$0xff]  ;;  %v3337_v47 = vld [vmem:[%s3633_s2 + $0x64] sm:$0xf0]  ;;  %v3329_v48 = vld [vmem:[%s3633_s2 + $0x2c] sm:$0xf]  ;;  %v2694_v50 = vor.u32 %v3336_v41, %v2693_v40  ;;  %v2698_v51 = vor.u32 %v3328_v44, %v2695_v45 }
  0xb1   : > { %v2703_v49 = vld [vmem:[%s3633_s2 + $0x68] sm:$0xf0]  ;;  %v2702_v52 = vor.u32 %v3337_v47, %v2701_v46  ;;  %v2773_v54 = vld [vmem:[%s3633_s2 + $0xb0] sm:$0xf]  ;;  %v3346_v56 = vld [vmem:[%s3633_s2 + $0xb4] sm:$0xf] }
  0xb2   : > { %1069 = vmatpush.bf16.msra.mxu0 %v2754_v4  ;;  %1031 = vmatpush.bf16.msrb.mxu1 %v2678_v7  ;;  %v3354_v55 = vld [vmem:[%s3633_s2 + $0xec] sm:$0xf0]  ;;  %v2781_v58 = vld [vmem:[%s3633_s2 + $0xb8] sm:$0xf]  ;;  %v3347_v60 = vld [vmem:[%s3633_s2 + $0xbc] sm:$0xf] }
  0xb3   : > { %v3355_v59 = vld [vmem:[%s3633_s2 + $0xf4] sm:$0xf0]  ;;  %v2783_v61 = vld [vmem:[%s3633_s2 + $0xf8] sm:$0xf0]  ;;  %v2774_v62 = vor.u32 %v3354_v55, %v2773_v54  ;;  %v2709_v0 = vld [vmem:[%s3633_s2 + $0x30] sm:$0xf] }
  0xb4   : > { %v3338_v1 = vld [vmem:[%s3633_s2 + $0x6c] sm:$0xf0]  ;;  %v2782_v2 = vor.u32 %v3355_v59, %v2781_v58  ;;  %v3330_v4 = vld [vmem:[%s3633_s2 + $0x34] sm:$0xf]  ;;  %v3339_v7 = vld [vmem:[%s3633_s2 + $0x74] sm:$0xf0] }
  0xb5   : > { %v2711_v5 = vld [vmem:[%s3633_s2 + $0x70] sm:$0xf0]  ;;  %v3384_v29 = vld [vmem:[%s3648_s17 + $0xe0] sm:$0xff]  ;;  %v3359_v32 = vld [vmem:[%s3648_s17 + $0x18] sm:$0xff] }
  0xb6   : > { %v3368_v30 = vld [vmem:[%s3648_s17 + $0x60] sm:$0xff]  ;;  %v3383_v33 = vld [vmem:[%s3648_s17 + $0xd8] sm:$0xff]  ;;  %v3358_v37 = vld [vmem:[%s3648_s17 + $0x10] sm:$0xff] }
  0xb7   : > { %v3376_v31 = vld [vmem:[%s3648_s17 + $0xa0] sm:$0xff]  ;;  %v3367_v35 = vld [vmem:[%s3648_s17 + $0x58] sm:$0xff]  ;;  %v3374_v40 = vld [vmem:[%s3648_s17 + $0x90] sm:$0xff] }
  0xb8   : > { %v3375_v36 = vld [vmem:[%s3648_s17 + $0x98] sm:$0xff]  ;;  %v3357_v41 = vld [vmem:[%s3648_s17 + $0x8] sm:$0xff]  ;;  %v3356_v44 = vld [vmem:[%s3648_s17] sm:$0xff] }
  0xb9   : > { %v3380_v45 = vld [vmem:[%s3648_s17 + $0xc0] sm:$0xff]  ;;  %v3395_v46 = vld [vmem:[%s3648_s17 + $0x138] sm:$0xff]  ;;  %v3402_v54 = vld [vmem:[%s3648_s17 + $0x170] sm:$0xff] }
  0xba   : > { %v3419_v47 = vld [vmem:[%s3648_s17 + $0x1f8] sm:$0xff]  ;;  %v3410_v55 = vld [vmem:[%s3648_s17 + $0x1b0] sm:$0xff]  ;;  %v3401_v58 = vld [vmem:[%s3648_s17 + $0x168] sm:$0xff] }
  0xbb   : > { %v3409_v59 = vld [vmem:[%s3648_s17 + $0x1a8] sm:$0xff] }
 0x126   : > { %v696_v12 = vpop.f32.mrf.mxu0 }
 0x127   : > { %v697_v13 = vadd.f32 %v3494_v11, %v696_v12  ;;  %v2682_v11 = vor.u32 %v3326_v6, %v2679_v8  ;;  %v2717_v6 = vld [vmem:[%s3633_s2 + $0x38] sm:$0xf]  ;;  %v3331_v8 = vld [vmem:[%s3633_s2 + $0x3c] sm:$0xf] }
 0x129   : > { %v700_v14 = vadd.f32 %v697_v13, %v661_v9  ;;  %v2685_v9 = vld [vmem:[%s3633_s2 + $0x18] sm:$0xf]  ;;  %v3327_v13 = vld [vmem:[%s3633_s2 + $0x1c] sm:$0xf]  ;;  %1044 = vmatpush.bf16.msrb.mxu2 %v2682_v11  ;;  %v2714_v11 = vor.u32 %v3330_v4, %v2711_v5 }
 0x12a   : > { %v2686_v12 = vor.u32 %v3335_v10, %v2685_v9  ;;  %v2719_v9 = vld [vmem:[%s3633_s2 + $0x78] sm:$0xf0]  ;;  %v2710_v10 = vor.u32 %v3338_v1, %v2709_v0 }
 0x12b   : > { %v703_v15 = vsel %vm683_vm2, %v700_v14, 0.0  ;;  %v3391_v0 = vld [vmem:[%s3648_s17 + $0x118] sm:$0xff] }
 0x12c   : > { %704 = vadd.xlane.f32.xlu0 %v703_v15  ;;  %1057 = vmatpush.bf16.msrb.mxu3 %v2686_v12  ;;  %v2718_v12 = vor.u32 %v3339_v7, %v2717_v6  ;;  %v3415_v1 = vld [vmem:[%s3648_s17 + $0x1d8] sm:$0xff]  ;;  %v3389_v6 = vld [vmem:[%s3648_s17 + $0x108] sm:$0xff] }
 0x12d   : > { %v3399_v4 = vld [vmem:[%s3648_s17 + $0x158] sm:$0xff]  ;;  %v3413_v7 = vld [vmem:[%s3648_s17 + $0x1c8] sm:$0xff] }
 0x12e   : > { %v698_v16 = vpop.f32.mrf.mxu0  ;;  %v3407_v5 = vld [vmem:[%s3648_s17 + $0x198] sm:$0xff] }
 0x19f   : > { %v705_v24 = vpop.xlane.xlu0 %704 }
 0x1a0   : > { %v713_v25 = vmul.f32 %v3678_v23, %v705_v24 }
 0x1a2   : > { %v3681_v26 = vsub.f32 %v700_v14, %v713_v25  ;;  %v2687_v14 = vld [vmem:[%s3633_s2 + $0x58] sm:$0xf0]  ;;  %v3496_v25 = vld [vmem:[%s4018_s26] ss:$0 sm:$0xff] }
 0x1a3   : > { %v2690_v15 = vor.u32 %v3327_v13, %v2687_v14  ;;  %v2722_v13 = vor.u32 %v3331_v8, %v2719_v9  ;;  %v3363_v14 = vld [vmem:[%s3648_s17 + $0x38] sm:$0xff]  ;;  %v3398_v8 = vld [vmem:[%s3648_s17 + $0x150] sm:$0xff] }
 0x1a4   : > { %v715_v27 = vmul.f32 %v3681_v26, %v3681_v26  ;;  %v3406_v9 = vld [vmem:[%s3648_s17 + $0x190] sm:$0xff] }
 0x1a5   : > { %1070 = vmatpush.bf16.msra.mxu0 %v2690_v15  ;;  %v3387_v15 = vld [vmem:[%s3648_s17 + $0xf8] sm:$0xff] }
 0x1a6   : > { %v716_v28 = vsel %vm683_vm2, %v715_v27, 0.0 }
 0x1a7   : > { %717 = vadd.xlane.f32.xlu0 %v716_v28 }
 0x21a   : > { %v718_v53 = vpop.xlane.xlu0 %717 }
 0x21b   : > { %v719_v57 = vmul.f32 %v718_v53, %v3678_v23  ;;  %v2706_v53 = vor.u32 %v3329_v48, %v2703_v49  ;;  %v3364_v48 = vld [vmem:[%s3648_s17 + $0x40] sm:$0xff] }
 0x21c   : > { %v3372_v49 = vld [vmem:[%s3648_s17 + $0x80] sm:$0xff] }
 0x21d   : > { %v720_v3 = vadd.f32 1e-05, %v719_v57  ;;  %v2775_v57 = vld [vmem:[%s3633_s2 + $0xf0] sm:$0xf0] }
 0x21e   : > { %v2778_v63 = vor.u32 %v3346_v56, %v2775_v57  ;;  %v3393_v56 = vld [vmem:[%s3648_s17 + $0x128] sm:$0xff] }
 0x21f   : > { %3502 = vrsqrt.f32 %v720_v3  ;;  %vm727_vm5 = vweird.f32 %v720_v3  ;;  %v3417_v57 = vld [vmem:[%s3648_s17 + $0x1e8] sm:$0xff] }
 0x225   : > { %v3503_v16 = vpop.eup %3502 }
 0x226   : > { %v722_v17 = vmul.f32 %v3503_v16, %v720_v3  ;;  %vm728_vm4 = vweird.f32 %v3503_v16  ;;  %v2786_v3 = vor.u32 %v3347_v60, %v2783_v61  ;;  %v3392_v60 = vld [vmem:[%s3648_s17 + $0x120] sm:$0xff] }
 0x227   : > { %vm729_vm6 = vmor %vm727_vm5, %vm728_vm4  ;;  %v3416_v61 = vld [vmem:[%s3648_s17 + $0x1e0] sm:$0xff] }
 0x228   : > { %v723_v18 = vmul.f32 %v3503_v16, %v722_v17  ;;  %v3379_v17 = vld [vmem:[%s3648_s17 + $0xb8] sm:$0xff] }
 0x22a   : > { %v724_v19 = vmul.f32 0.5, %v723_v18  ;;  %v3362_v18 = vld [vmem:[%s3648_s17 + $0x30] sm:$0xff] }
 0x22c   : > { %v725_v20 = vsub.f32 1.5, %v724_v19  ;;  %v3386_v19 = vld [vmem:[%s3648_s17 + $0xf0] sm:$0xff] }
 0x22e   : > { %v726_v21 = vmul.f32 %v3503_v16, %v725_v20  ;;  %v3370_v20 = vld [vmem:[%s3648_s17 + $0x70] sm:$0xff] }
 0x230   : > { %v730_v24 = vsel %vm729_vm6, %v3503_v16, %v726_v21  ;;  %v3371_v16 = vld [vmem:[%s3648_s17 + $0x78] sm:$0xff]  ;;  %v3378_v21 = vld [vmem:[%s3648_s17 + $0xb0] sm:$0xff] }
 0x231   : > { %v731_v27 = vmul.f32 %v730_v24, %v3681_v26  ;;  %v3385_v24 = vld [vmem:[%s3648_s17 + $0xe8] sm:$0xff] }
 0x233   : > { %v735_v28 = vmul.f32 %v3495_v22, %v731_v27  ;;  %v3361_v22 = vld [vmem:[%s3648_s17 + $0x28] sm:$0xff] }
 0x234   : > { %v3377_v27 = vld [vmem:[%s3648_s17 + $0xa8] sm:$0xff] }
 0x235   : > { %v3735_v34 = vadd.f32 %v3496_v25, %v735_v28  ;;  %v3369_v25 = vld [vmem:[%s3648_s17 + $0x68] sm:$0xff]  ;;  %v3360_v28 = vld [vmem:[%s3648_s17 + $0x20] sm:$0xff] }
 0x237   : > { %v3742_v26 = vpack.c.bf16 %v3735_v34, %v3735_v34 }
 0x239   : > { %2787 = vmatmul.msk.bf16.vlgmr.msra.gmra.mxu1 %vm683_vm2, %v3742_v26  ;;  %2788 = vmatmul.msk.bf16.vlgmr.msra.gmra.mxu2 %vm683_vm2, %v3742_v26 }
 0x23a   : > { %2789 = vmatmul.msk.bf16.vlgmr.msra.gmra.mxu3 %vm683_vm2, %v3742_v26  ;;  %2790 = vmatmul.msk.bf16.vlgmr.msrb.gmra.mxu0 %vm683_vm2, %v3742_v26 }
 0x23b   : > { %1082 = vmatpush.bf16.msra.mxu1 %v2758_v38  ;;  %1095 = vmatpush.bf16.msra.mxu2 %v2762_v39  ;;  %v3382_v38 = vld [vmem:[%s3648_s17 + $0xd0] sm:$0xff] }
 0x23c   : > { %1108 = vmatpush.bf16.msra.mxu3 %v2766_v42  ;;  %1121 = vmatpush.bf16.msrb.mxu0 %v2770_v43  ;;  %v3366_v39 = vld [vmem:[%s3648_s17 + $0x50] sm:$0xff]  ;;  %v3365_v42 = vld [vmem:[%s3648_s17 + $0x48] sm:$0xff] }
 0x23d   : > { %v3373_v43 = vld [vmem:[%s3648_s17 + $0x88] sm:$0xff] }
 0x23f   : > { %1083 = vmatpush.bf16.msra.mxu1 %v2694_v50  ;;  %1096 = vmatpush.bf16.msra.mxu2 %v2698_v51  ;;  %v3403_v50 = vld [vmem:[%s3648_s17 + $0x178] sm:$0xff] }
 0x240   : > { %1109 = vmatpush.bf16.msra.mxu3 %v2702_v52  ;;  %1122 = vmatpush.bf16.msrb.mxu0 %v2706_v53  ;;  %v3411_v51 = vld [vmem:[%s3648_s17 + $0x1b8] sm:$0xff]  ;;  %v3394_v52 = vld [vmem:[%s3648_s17 + $0x130] sm:$0xff] }
 0x241   : > { %v3418_v53 = vld [vmem:[%s3648_s17 + $0x1f0] sm:$0xff] }
 0x249   : > { %2791 = vmatmul.msk.bf16.vlgmr.msrb.gmra.mxu1 %vm683_vm2, %v3742_v26  ;;  %2792 = vmatmul.msk.bf16.vlgmr.msrb.gmra.mxu2 %vm683_vm2, %v3742_v26 }
 0x24a   : > { %2793 = vmatmul.msk.bf16.vlgmr.msrb.gmra.mxu3 %vm683_vm2, %v3742_v26  ;;  %2794 = vmatmul.msk.bf16.vlgmr.msra.gmra.mxu0 %vm683_vm2, %v3742_v26 }
 0x24b   : > { %1134 = vmatpush.bf16.msrb.mxu1 %v2774_v62  ;;  %1147 = vmatpush.bf16.msrb.mxu2 %v2778_v63  ;;  %v3400_v62 = vld [vmem:[%s3648_s17 + $0x160] sm:$0xff] }
 0x24c   : > { %1160 = vmatpush.bf16.msrb.mxu3 %v2782_v2  ;;  %1173 = vmatpush.bf16.msra.mxu0 %v2786_v3  ;;  %v3408_v63 = vld [vmem:[%s3648_s17 + $0x1a0] sm:$0xff]  ;;  %v3390_v2 = vld [vmem:[%s3648_s17 + $0x110] sm:$0xff] }
 0x24d   : > { %v3414_v3 = vld [vmem:[%s3648_s17 + $0x1d0] sm:$0xff] }
 0x24f   : > { %1135 = vmatpush.bf16.msrb.mxu1 %v2710_v10  ;;  %1148 = vmatpush.bf16.msrb.mxu2 %v2714_v11  ;;  %v3388_v10 = vld [vmem:[%s3648_s17 + $0x100] sm:$0xff] }
 0x250   : > { %1161 = vmatpush.bf16.msrb.mxu3 %v2718_v12  ;;  %1174 = vmatpush.bf16.msra.mxu0 %v2722_v13  ;;  %v3412_v11 = vld [vmem:[%s3648_s17 + $0x1c0] sm:$0xff]  ;;  %v3397_v12 = vld [vmem:[%s3648_s17 + $0x148] sm:$0xff] }
 0x251   : > { %v3405_v13 = vld [vmem:[%s3648_s17 + $0x188] sm:$0xff] }
 0x259   : > { %2795 = vmatmul.msk.bf16.vlgmr.msra.gmra.mxu1 %vm683_vm2, %v3742_v26  ;;  %2796 = vmatmul.msk.bf16.vlgmr.msra.gmra.mxu2 %vm683_vm2, %v3742_v26 }
 0x25a   : > { %2797 = vmatmul.msk.bf16.vlgmr.msra.gmra.mxu3 %vm683_vm2, %v3742_v26  ;;  %2798 = vmatmul.msk.bf16.vlgmr.msrb.gmra.mxu0 %vm683_vm2, %v3742_v26 }
 0x25b   : > { %2240 = vmatpush.bf16.msra.mxu1 %v3363_v14  ;;  %2279 = vmatpush.bf16.msrb.mxu0 %v3387_v15  ;;  %v3396_v14 = vld [vmem:[%s3648_s17 + $0x140] sm:$0xff] }
 0x25c   : > { %2253 = vmatpush.bf16.msra.mxu2 %v3371_v16  ;;  %2266 = vmatpush.bf16.msra.mxu3 %v3379_v17  ;;  %v3404_v15 = vld [vmem:[%s3648_s17 + $0x180] sm:$0xff] }
 0x25d   : > { %v3865_v16 = vld [vmem:[%s3638_s25] sm:$0xff] }
 0x25e   : > { %v777_v17 = vperm.slane %v3865_v16, 0 }
 0x25f   : > { %2241 = vmatpush.bf16.msra.mxu1 %v3362_v18  ;;  %2280 = vmatpush.bf16.msrb.mxu0 %v3386_v19  ;;  %v780_v18 = vperm.slane %v3865_v16, 3 }
 0x260   : > { %2254 = vmatpush.bf16.msra.mxu2 %v3370_v20  ;;  %2267 = vmatpush.bf16.msra.mxu3 %v3378_v21 }
 0x263   : > { %2242 = vmatpush.bf16.msra.mxu1 %v3361_v22  ;;  %2281 = vmatpush.bf16.msrb.mxu0 %v3385_v24 }
 0x264   : > { %2255 = vmatpush.bf16.msra.mxu2 %v3369_v25  ;;  %2268 = vmatpush.bf16.msra.mxu3 %v3377_v27  ;;  %v778_v25 = vperm.slane %v3865_v16, 1 }
 0x267   : > { %2243 = vmatpush.bf16.msra.mxu1 %v3360_v28  ;;  %2282 = vmatpush.bf16.msrb.mxu0 %v3384_v29  ;;  %v779_v28 = vperm.slane %v3865_v16, 2  ;;  %v3427_v29 = vld [vmem:[%s3648_s17 + $0x238] sm:$0xff] }
 0x268   : > { %2256 = vmatpush.bf16.msra.mxu2 %v3368_v30  ;;  %2269 = vmatpush.bf16.msra.mxu3 %v3376_v31  ;;  %v3451_v31 = vld [vmem:[%s3648_s17 + $0x2f8] sm:$0xff] }
 0x269   : > { %2799 = vmatmul.msk.bf16.vlgmr.msrb.gmra.mxu1 %vm683_vm2, %v3742_v26  ;;  %2800 = vmatmul.msk.bf16.vlgmr.msrb.gmra.mxu2 %vm683_vm2, %v3742_v26 }
 0x26a   : > { %2801 = vmatmul.msk.bf16.vlgmr.msrb.gmra.mxu3 %vm683_vm2, %v3742_v26  ;;  %2802 = vmatmul.msk.bf16.vlgmr.msra.gmra.mxu0 %vm683_vm2, %v3742_v26  ;;  %v3381_v26 = vld [vmem:[%s3648_s17 + $0xc8] sm:$0xff] }
 0x26b   : > { %2244 = vmatpush.bf16.msra.mxu1 %v3359_v32  ;;  %2283 = vmatpush.bf16.msrb.mxu0 %v3383_v33 }
 0x26c   : > { %2257 = vmatpush.bf16.msra.mxu2 %v3367_v35  ;;  %2270 = vmatpush.bf16.msra.mxu3 %v3375_v36 }
 0x26f   : > { %2245 = vmatpush.bf16.msra.mxu1 %v3358_v37  ;;  %2284 = vmatpush.bf16.msrb.mxu0 %v3382_v38 }
 0x270   : > { %2258 = vmatpush.bf16.msra.mxu2 %v3366_v39  ;;  %2271 = vmatpush.bf16.msra.mxu3 %v3374_v40  ;;  %v3426_v39 = vld [vmem:[%s3648_s17 + $0x230] sm:$0xff] }
 0x273   : > { %2246 = vmatpush.bf16.msra.mxu1 %v3357_v41  ;;  %2285 = vmatpush.bf16.msrb.mxu0 %v3381_v26  ;;  %v3450_v26 = vld [vmem:[%s3648_s17 + $0x2f0] sm:$0xff] }
 0x274   : > { %2259 = vmatpush.bf16.msra.mxu2 %v3365_v42  ;;  %2272 = vmatpush.bf16.msra.mxu3 %v3373_v43  ;;  %v3435_v43 = vld [vmem:[%s3648_s17 + $0x278] sm:$0xff] }
 0x277   : > { %2247 = vmatpush.bf16.msra.mxu1 %v3356_v44  ;;  %2286 = vmatpush.bf16.msrb.mxu0 %v3380_v45  ;;  %v3443_v45 = vld [vmem:[%s3648_s17 + $0x2b8] sm:$0xff] }
 0x278   : > { %2260 = vmatpush.bf16.msra.mxu2 %v3364_v48  ;;  %2273 = vmatpush.bf16.msra.mxu3 %v3372_v49  ;;  %v3449_v48 = vld [vmem:[%s3648_s17 + $0x2e8] sm:$0xff]  ;;  %v781_v49 = vperm.slane %v3865_v16, 4 }
 0x27b   : > { %2292 = vmatpush.bf16.msrb.mxu1 %v3395_v46  ;;  %2331 = vmatpush.bf16.msra.mxu0 %v3419_v47  ;;  %v3425_v47 = vld [vmem:[%s3648_s17 + $0x228] sm:$0xff] }
 0x27c   : > { %2305 = vmatpush.bf16.msrb.mxu2 %v3403_v50  ;;  %2318 = vmatpush.bf16.msrb.mxu3 %v3411_v51  ;;  %v784_v51 = vperm.slane %v3865_v16, 7 }
 0x27f   : > { %2293 = vmatpush.bf16.msrb.mxu1 %v3394_v52  ;;  %2332 = vmatpush.bf16.msra.mxu0 %v3418_v53  ;;  %v3434_v52 = vld [vmem:[%s3648_s17 + $0x270] sm:$0xff] }
 0x280   : > { %2306 = vmatpush.bf16.msrb.mxu2 %v3402_v54  ;;  %2319 = vmatpush.bf16.msrb.mxu3 %v3410_v55  ;;  %v3442_v54 = vld [vmem:[%s3648_s17 + $0x2b0] sm:$0xff] }
 0x283   : > { %2294 = vmatpush.bf16.msrb.mxu1 %v3393_v56  ;;  %2333 = vmatpush.bf16.msra.mxu0 %v3417_v57  ;;  %v3424_v56 = vld [vmem:[%s3648_s17 + $0x220] sm:$0xff] }
 0x284   : > { %2307 = vmatpush.bf16.msrb.mxu2 %v3401_v58  ;;  %2320 = vmatpush.bf16.msrb.mxu3 %v3409_v59  ;;  %v3448_v59 = vld [vmem:[%s3648_s17 + $0x2e0] sm:$0xff] }
 0x287   : > { %2295 = vmatpush.bf16.msrb.mxu1 %v3392_v60  ;;  %2334 = vmatpush.bf16.msra.mxu0 %v3416_v61  ;;  %v3433_v61 = vld [vmem:[%s3648_s17 + $0x268] sm:$0xff] }
 0x288   : > { %2308 = vmatpush.bf16.msrb.mxu2 %v3400_v62  ;;  %2321 = vmatpush.bf16.msrb.mxu3 %v3408_v63  ;;  %v3441_v63 = vld [vmem:[%s3648_s17 + $0x2a8] sm:$0xff] }
 0x28b   : > { %2296 = vmatpush.bf16.msrb.mxu1 %v3391_v0  ;;  %2335 = vmatpush.bf16.msra.mxu0 %v3415_v1  ;;  %v782_v0 = vperm.slane %v3865_v16, 5 }
 0x28c   : > { %2309 = vmatpush.bf16.msrb.mxu2 %v3399_v4  ;;  %2322 = vmatpush.bf16.msrb.mxu3 %v3407_v5  ;;  %v3447_v5 = vld [vmem:[%s3648_s17 + $0x2d8] sm:$0xff] }
 0x28f   : > { %2297 = vmatpush.bf16.msrb.mxu1 %v3390_v2  ;;  %2336 = vmatpush.bf16.msra.mxu0 %v3414_v3  ;;  %v783_v2 = vperm.slane %v3865_v16, 6  ;;  %v3423_v3 = vld [vmem:[%s3648_s17 + $0x218] sm:$0xff] }
 0x290   : > { %2310 = vmatpush.bf16.msrb.mxu2 %v3398_v8  ;;  %2323 = vmatpush.bf16.msrb.mxu3 %v3406_v9  ;;  %v3432_v8 = vld [vmem:[%s3648_s17 + $0x260] sm:$0xff] }
 0x293   : > { %2298 = vmatpush.bf16.msrb.mxu1 %v3389_v6  ;;  %2337 = vmatpush.bf16.msra.mxu0 %v3413_v7 }
 0x294   : > { %2311 = vmatpush.bf16.msrb.mxu2 %v3397_v12  ;;  %2324 = vmatpush.bf16.msrb.mxu3 %v3405_v13 }
 0x297   : > { %2299 = vmatpush.bf16.msrb.mxu1 %v3388_v10  ;;  %2338 = vmatpush.bf16.msra.mxu0 %v3412_v11  ;;  %v3440_v11 = vld [vmem:[%s3648_s17 + $0x2a0] sm:$0xff] }
 0x298   : > { %2312 = vmatpush.bf16.msrb.mxu2 %v3396_v14  ;;  %2325 = vmatpush.bf16.msrb.mxu3 %v3404_v15  ;;  %v3422_v14 = vld [vmem:[%s3648_s17 + $0x210] sm:$0xff] }
 0x2b6   : > { %v981_v19 = vpop.f32.mrf.mxu1 }
 0x2b7   : > { %v982_v20 = vadd.f32 %v981_v19, %v777_v17  ;;  %v1020_v21 = vpop.f32.mrf.mxu0  ;;  %v3446_v17 = vld [vmem:[%s3648_s17 + $0x2d0] sm:$0xff]  ;;  %v3431_v19 = vld [vmem:[%s3648_s17 + $0x258] sm:$0xff] }
 0x2b8   : > { %v1021_v22 = vadd.f32 %v1020_v21, %v780_v18 }
 0x2b9   : > { %v1180_v24 = vmax.f32 %v982_v20, 0.0  ;;  %v3897_v20 = vld [vmem:[%s3638_s25 + $0x8] sm:$0xff] }
 0x2ba   : > { %v1183_v27 = vmax.f32 %v1021_v22, 0.0  ;;  %v3439_v22 = vld [vmem:[%s3648_s17 + $0x298] sm:$0xff] }
 0x2bb   : > { %v1196_v30 = vpack.c.bf16 %v1180_v24, %v1180_v24 }
 0x2bc   : > { %v1199_v32 = vpack.c.bf16 %v1183_v27, %v1183_v27  ;;  %v994_v33 = vpop.f32.mrf.mxu2  ;;  %v3445_v27 = vld [vmem:[%s3648_s17 + $0x2c8] sm:$0xff] }
 0x2bd   : > { %v995_v35 = vadd.f32 %v994_v33, %v778_v25  ;;  %v1007_v36 = vpop.f32.mrf.mxu3  ;;  %2248 = vmatmul.bf16.vlgmr.msra.gmra.mxu1 %v1196_v30  ;;  %v3421_v25 = vld [vmem:[%s3648_s17 + $0x208] sm:$0xff]  ;;  %v788_v30 = vperm.slane %v3897_v20, 3  ;;  %v3438_v33 = vld [vmem:[%s3648_s17 + $0x290] sm:$0xff] }
 0x2be   : > { %v1008_v37 = vadd.f32 %v1007_v36, %v779_v28  ;;  %2287 = vmatmul.bf16.vlgmr.msrb.gmra.mxu0 %v1199_v32  ;;  %2344 = vmatpush.bf16.msra.mxu1 %v3427_v29  ;;  %v983_v38 = vpop.f32.mrf.mxu1  ;;  %v785_v28 = vperm.slane %v3897_v20, 0  ;;  %v3420_v36 = vld [vmem:[%s3648_s17 + $0x200] sm:$0xff] }
 0x2bf   : > { %v1181_v40 = vmax.f32 %v995_v35, 0.0  ;;  %2383 = vmatpush.bf16.msrb.mxu0 %v3451_v31  ;;  %v1022_v41 = vpop.f32.mrf.mxu0  ;;  %v3430_v31 = vld [vmem:[%s3648_s17 + $0x250] sm:$0xff] }
 0x2c0   : > { %v1182_v42 = vmax.f32 %v1008_v37, 0.0 }
 0x2c1   : > { %v1197_v44 = vpack.c.bf16 %v1181_v40, %v1181_v40  ;;  %v3459_v40 = vld [vmem:[%s3648_s17 + $0x338] sm:$0xff] }
 0x2c2   : > { %v1198_v46 = vpack.c.bf16 %v1182_v42, %v1182_v42  ;;  %2345 = vmatpush.bf16.msra.mxu1 %v3426_v39  ;;  %v3444_v39 = vld [vmem:[%s3648_s17 + $0x2c0] sm:$0xff]  ;;  %v3429_v42 = vld [vmem:[%s3648_s17 + $0x248] sm:$0xff] }
 0x2c3   : > { %2384 = vmatpush.bf16.msrb.mxu0 %v3450_v26  ;;  %2261 = vmatmul.bf16.vlgmr.msra.gmra.mxu2 %v1197_v44  ;;  %v3483_v26 = vld [vmem:[%s3648_s17 + $0x3f8] sm:$0xff]  ;;  %v3437_v44 = vld [vmem:[%s3648_s17 + $0x288] sm:$0xff] }
 0x2c4   : > { %2274 = vmatmul.bf16.vlgmr.msra.gmra.mxu3 %v1198_v46  ;;  %2357 = vmatpush.bf16.msra.mxu2 %v3435_v43  ;;  %v996_v50 = vpop.f32.mrf.mxu2 }
 0x2c5   : > { %2370 = vmatpush.bf16.msra.mxu3 %v3443_v45  ;;  %v1009_v53 = vpop.f32.mrf.mxu3  ;;  %v786_v45 = vperm.slane %v3897_v20, 1 }
 0x2c6   : > { %2346 = vmatpush.bf16.msra.mxu1 %v3425_v47  ;;  %v1033_v55 = vpop.f32.mrf.mxu1  ;;  %v787_v47 = vperm.slane %v3897_v20, 2  ;;  %v3428_v53 = vld [vmem:[%s3648_s17 + $0x240] sm:$0xff] }
 0x2c7   : > { %2385 = vmatpush.bf16.msrb.mxu0 %v3449_v48  ;;  %v1034_v57 = vadd.f32 %v1033_v55, %v781_v49  ;;  %v1072_v58 = vpop.f32.mrf.mxu0  ;;  %v3458_v49 = vld [vmem:[%s3648_s17 + $0x330] sm:$0xff] }
 0x2c8   : > { %v1073_v60 = vadd.f32 %v1072_v58, %v784_v51  ;;  %2358 = vmatpush.bf16.msra.mxu2 %v3434_v52  ;;  %v3482_v52 = vld [vmem:[%s3648_s17 + $0x3f0] sm:$0xff] }
 0x2c9   : > { %v1184_v62 = vmax.f32 %v1034_v57, 0.0  ;;  %2371 = vmatpush.bf16.msra.mxu3 %v3442_v54  ;;  %v3467_v57 = vld [vmem:[%s3648_s17 + $0x378] sm:$0xff] }
 0x2ca   : > { %v1187_v1 = vmax.f32 %v1073_v60, 0.0  ;;  %2347 = vmatpush.bf16.msra.mxu1 %v3424_v56  ;;  %v3436_v56 = vld [vmem:[%s3648_s17 + $0x280] sm:$0xff]  ;;  %v3475_v60 = vld [vmem:[%s3648_s17 + $0x3b8] sm:$0xff] }
 0x2cb   : > { %v1200_v4 = vpack.c.bf16 %v1184_v62, %v1184_v62  ;;  %2386 = vmatpush.bf16.msrb.mxu0 %v3448_v59 }
 0x2cc   : > { %v1203_v6 = vpack.c.bf16 %v1187_v1, %v1187_v1  ;;  %2359 = vmatpush.bf16.msra.mxu2 %v3433_v61  ;;  %v1046_v7 = vpop.f32.mrf.mxu2  ;;  %v3481_v1 = vld [vmem:[%s3648_s17 + $0x3e8] sm:$0xff] }
 0x2cd   : > { %2372 = vmatpush.bf16.msra.mxu3 %v3441_v63  ;;  %v1047_v9 = vadd.f32 %v1046_v7, %v782_v0  ;;  %v1059_v10 = vpop.f32.mrf.mxu3  ;;  %2300 = vmatmul.bf16.vlgmr.msrb.gmra.mxu1 %v1200_v4  ;;  %v3457_v63 = vld [vmem:[%s3648_s17 + $0x328] sm:$0xff] }
 0x2ce   : > { %v1060_v12 = vadd.f32 %v1059_v10, %v783_v2  ;;  %2339 = vmatmul.bf16.vlgmr.msra.gmra.mxu0 %v1203_v6  ;;  %2348 = vmatpush.bf16.msra.mxu1 %v3423_v3  ;;  %v1035_v13 = vpop.f32.mrf.mxu1  ;;  %v3466_v3 = vld [vmem:[%s3648_s17 + $0x370] sm:$0xff]  ;;  %v3456_v6 = vld [vmem:[%s3648_s17 + $0x320] sm:$0xff]  ;;  %v3465_v10 = vld [vmem:[%s3648_s17 + $0x368] sm:$0xff] }
 0x2cf   : > { %v1185_v15 = vmax.f32 %v1047_v9, 0.0  ;;  %2387 = vmatpush.bf16.msrb.mxu0 %v3447_v5  ;;  %v1074_v16 = vpop.f32.mrf.mxu0  ;;  %v3474_v5 = vld [vmem:[%s3648_s17 + $0x3b0] sm:$0xff] }
 0x2d0   : > { %v1186_v18 = vmax.f32 %v1060_v12, 0.0  ;;  %2360 = vmatpush.bf16.msra.mxu2 %v3432_v8  ;;  %v3480_v8 = vld [vmem:[%s3648_s17 + $0x3e0] sm:$0xff]  ;;  %v3473_v12 = vld [vmem:[%s3648_s17 + $0x3a8] sm:$0xff] }
 0x2d1   : > { %v1201_v21 = vpack.c.bf16 %v1185_v15, %v1185_v15  ;;  %2373 = vmatpush.bf16.msra.mxu3 %v3440_v11  ;;  %v3479_v15 = vld [vmem:[%s3648_s17 + $0x3d8] sm:$0xff]  ;;  %v3464_v16 = vld [vmem:[%s3648_s17 + $0x360] sm:$0xff] }
 0x2d2   : > { %v1202_v24 = vpack.c.bf16 %v1186_v18, %v1186_v18  ;;  %2349 = vmatpush.bf16.msra.mxu1 %v3422_v14  ;;  %v3455_v14 = vld [vmem:[%s3648_s17 + $0x318] sm:$0xff]  ;;  %v3454_v18 = vld [vmem:[%s3648_s17 + $0x310] sm:$0xff] }
 0x2d3   : > { %2388 = vmatpush.bf16.msrb.mxu0 %v3446_v17  ;;  %2313 = vmatmul.bf16.vlgmr.msrb.gmra.mxu2 %v1201_v21  ;;  %v3472_v17 = vld [vmem:[%s3648_s17 + $0x3a0] sm:$0xff] }
 0x2d4   : > { %2326 = vmatmul.bf16.vlgmr.msrb.gmra.mxu3 %v1202_v24  ;;  %2361 = vmatpush.bf16.msra.mxu2 %v3431_v19  ;;  %v1048_v29 = vpop.f32.mrf.mxu2  ;;  %v789_v19 = vperm.slane %v3897_v20, 4  ;;  %v792_v24 = vperm.slane %v3897_v20, 7 }
 0x2d5   : > { %2374 = vmatpush.bf16.msra.mxu3 %v3439_v22  ;;  %v1061_v32 = vpop.f32.mrf.mxu3  ;;  %v3478_v22 = vld [vmem:[%s3648_s17 + $0x3d0] sm:$0xff]  ;;  %v3471_v29 = vld [vmem:[%s3648_s17 + $0x398] sm:$0xff] }
 0x2d6   : > { %2350 = vmatpush.bf16.msra.mxu1 %v3421_v25  ;;  %v1085_v35 = vpop.f32.mrf.mxu1 }
 0x2d7   : > { %2389 = vmatpush.bf16.msrb.mxu0 %v3445_v27  ;;  %v1086_v37 = vadd.f32 %v1085_v35, %v785_v28  ;;  %v1124_v38 = vpop.f32.mrf.mxu0  ;;  %v3463_v27 = vld [vmem:[%s3648_s17 + $0x358] sm:$0xff] }
 0x2d8   : > { %v1125_v41 = vadd.f32 %v1124_v38, %v788_v30  ;;  %2362 = vmatpush.bf16.msra.mxu2 %v3430_v31  ;;  %v3453_v31 = vld [vmem:[%s3648_s17 + $0x308] sm:$0xff]  ;;  %v3470_v38 = vld [vmem:[%s3648_s17 + $0x390] sm:$0xff] }
 0x2d9   : > { %v1188_v43 = vmax.f32 %v1086_v37, 0.0  ;;  %2375 = vmatpush.bf16.msra.mxu3 %v3438_v33  ;;  %v3477_v33 = vld [vmem:[%s3648_s17 + $0x3c8] sm:$0xff]  ;;  %v790_v37 = vperm.slane %v3897_v20, 5 }
 0x2da   : > { %v1191_v46 = vmax.f32 %v1125_v41, 0.0  ;;  %2351 = vmatpush.bf16.msra.mxu1 %v3420_v36  ;;  %v3462_v36 = vld [vmem:[%s3648_s17 + $0x350] sm:$0xff] }
 0x2db   : > { %v1204_v48 = vpack.c.bf16 %v1188_v43, %v1188_v43  ;;  %2390 = vmatpush.bf16.msrb.mxu0 %v3444_v39  ;;  %v791_v39 = vperm.slane %v3897_v20, 6 }
 0x2dc   : > { %v1207_v50 = vpack.c.bf16 %v1191_v46, %v1191_v46  ;;  %2363 = vmatpush.bf16.msra.mxu2 %v3429_v42  ;;  %v1098_v51 = vpop.f32.mrf.mxu2  ;;  %v3476_v42 = vld [vmem:[%s3648_s17 + $0x3c0] sm:$0xff] }
 0x2dd   : > { %2376 = vmatpush.bf16.msra.mxu3 %v3437_v44  ;;  %v1099_v54 = vadd.f32 %v1098_v51, %v786_v45  ;;  %v1111_v55 = vpop.f32.mrf.mxu3  ;;  %2352 = vmatmul.bf16.vlgmr.msra.gmra.mxu1 %v1204_v48  ;;  %v3461_v45 = vld [vmem:[%s3648_s17 + $0x348] sm:$0xff] }
 0x2de   : > { %2396 = vmatpush.bf16.msrb.mxu1 %v3459_v40  ;;  %v1112_v58 = vadd.f32 %v1111_v55, %v787_v47  ;;  %2391 = vmatmul.bf16.vlgmr.msrb.gmra.mxu0 %v1207_v50  ;;  %v1087_v59 = vpop.f32.mrf.mxu1  ;;  %v3452_v40 = vld [vmem:[%s3648_s17 + $0x300] sm:$0xff]  ;;  %v3469_v47 = vld [vmem:[%s3648_s17 + $0x388] sm:$0xff] }
 0x2df   : > { %2435 = vmatpush.bf16.msra.mxu0 %v3483_v26  ;;  %v1189_v61 = vmax.f32 %v1099_v54, 0.0  ;;  %v1126_v62 = vpop.f32.mrf.mxu0  ;;  %v3460_v50 = vld [vmem:[%s3648_s17 + $0x340] sm:$0xff] }
 0x2e0   : > { %v1190_v0 = vmax.f32 %v1112_v58, 0.0  ;;  %2364 = vmatpush.bf16.msra.mxu2 %v3428_v53 }
 0x2e1   : > { %v1205_v2 = vpack.c.bf16 %v1189_v61, %v1189_v61  ;;  %2377 = vmatpush.bf16.msra.mxu3 %v3436_v56 }
 0x2e2   : > { %2397 = vmatpush.bf16.msrb.mxu1 %v3458_v49  ;;  %v1206_v4 = vpack.c.bf16 %v1190_v0, %v1190_v0 }
 0x2e3   : > { %2436 = vmatpush.bf16.msra.mxu0 %v3482_v52  ;;  %2365 = vmatmul.bf16.vlgmr.msra.gmra.mxu2 %v1205_v2  ;;  %v3468_v52 = vld [vmem:[%s3648_s17 + $0x380] sm:$0xff] }
 0x2e4   : > { %2409 = vmatpush.bf16.msrb.mxu2 %v3467_v57  ;;  %2378 = vmatmul.bf16.vlgmr.msra.gmra.mxu3 %v1206_v4  ;;  %v1100_v7 = vpop.f32.mrf.mxu2  ;;  %v3497_v4 = vld [vmem:[%s616_s29] ss:$0 sm:$0xff] }
 0x2e5   : > { %2422 = vmatpush.bf16.msrb.mxu3 %v3475_v60  ;;  %v1113_v9 = vpop.f32.mrf.mxu3 }
 0x2e6   : > { %2398 = vmatpush.bf16.msrb.mxu1 %v3457_v63  ;;  %v1137_v11 = vpop.f32.mrf.mxu1 }
 0x2e7   : > { %2437 = vmatpush.bf16.msra.mxu0 %v3481_v1  ;;  %v1176_v13 = vpop.f32.mrf.mxu0  ;;  %v1138_v32 = vadd.f32 %v1137_v11, %v789_v19 }
 0x2e8   : > { %2410 = vmatpush.bf16.msrb.mxu2 %v3466_v3  ;;  %v1177_v35 = vadd.f32 %v1176_v13, %v792_v24 }
 0x2e9   : > { %2423 = vmatpush.bf16.msrb.mxu3 %v3474_v5  ;;  %v1192_v41 = vmax.f32 %v1138_v32, 0.0 }
 0x2ea   : > { %2399 = vmatpush.bf16.msrb.mxu1 %v3456_v6  ;;  %v1195_v43 = vmax.f32 %v1177_v35, 0.0 }
 0x2eb   : > { %2438 = vmatpush.bf16.msra.mxu0 %v3480_v8  ;;  %v1208_v49 = vpack.c.bf16 %v1192_v41, %v1192_v41 }
 0x2ec   : > { %2411 = vmatpush.bf16.msrb.mxu2 %v3465_v10  ;;  %v1150_v21 = vpop.f32.mrf.mxu2  ;;  %v1211_v20 = vpack.c.bf16 %v1195_v43, %v1195_v43 }
 0x2ed   : > { %2424 = vmatpush.bf16.msrb.mxu3 %v3473_v12  ;;  %v1163_v25 = vpop.f32.mrf.mxu3  ;;  %v1151_v46 = vadd.f32 %v1150_v21, %v790_v37 }
 0x2ee   : > { %2400 = vmatpush.bf16.msrb.mxu1 %v3455_v14  ;;  %v1139_v28 = vpop.f32.mrf.mxu1  ;;  %v1164_v48 = vadd.f32 %v1163_v25, %v791_v39 }
 0x2ef   : > { %2439 = vmatpush.bf16.msra.mxu0 %v3479_v15  ;;  %v1178_v30 = vpop.f32.mrf.mxu0  ;;  %v1193_v51 = vmax.f32 %v1151_v46, 0.0 }
 0x2f0   : > { %2412 = vmatpush.bf16.msrb.mxu2 %v3464_v16  ;;  %v1194_v53 = vmax.f32 %v1164_v48, 0.0 }
 0x2f1   : > { %2425 = vmatpush.bf16.msrb.mxu3 %v3472_v17  ;;  %v1209_v54 = vpack.c.bf16 %v1193_v51, %v1193_v51 }
 0x2f2   : > { %2401 = vmatpush.bf16.msrb.mxu1 %v3454_v18  ;;  %v1210_v55 = vpack.c.bf16 %v1194_v53, %v1194_v53 }
 0x2f3   : > { %2440 = vmatpush.bf16.msra.mxu0 %v3478_v22 }
 0x2f4   : > { %2413 = vmatpush.bf16.msrb.mxu2 %v3463_v27  ;;  %v1152_v26 = vpop.f32.mrf.mxu2 }
 0x2f5   : > { %2426 = vmatpush.bf16.msrb.mxu3 %v3471_v29  ;;  %v1165_v44 = vpop.f32.mrf.mxu3 }
 0x2f6   : > { %2402 = vmatpush.bf16.msrb.mxu1 %v3453_v31 }
 0x2f7   : > { %2441 = vmatpush.bf16.msra.mxu0 %v3477_v33 }
 0x2f8   : > { %2414 = vmatpush.bf16.msrb.mxu2 %v3462_v36 }
 0x2f9   : > { %2427 = vmatpush.bf16.msrb.mxu3 %v3470_v38 }
 0x2fa   : > { %2403 = vmatpush.bf16.msrb.mxu1 %v3452_v40 }
 0x2fb   : > { %2442 = vmatpush.bf16.msra.mxu0 %v3476_v42 }
 0x2fc   : > { %2415 = vmatpush.bf16.msrb.mxu2 %v3461_v45 }
 0x2fd   : > { %2428 = vmatpush.bf16.msrb.mxu3 %v3469_v47  ;;  %2404 = vmatmul.bf16.vlgmr.msrb.gmra.mxu1 %v1208_v49 }
 0x2fe   : > { %2443 = vmatmul.bf16.vlgmr.msra.gmra.mxu0 %v1211_v20 }
 0x300   : > { %2416 = vmatpush.bf16.msrb.mxu2 %v3460_v50 }
 0x301   : > { %2429 = vmatpush.bf16.msrb.mxu3 %v3468_v52 }
 0x303   : > { %2417 = vmatmul.bf16.vlgmr.msrb.gmra.mxu2 %v1209_v54 }
 0x304   : > { %2430 = vmatmul.bf16.vlgmr.msrb.gmra.mxu3 %v1210_v55 }
 0x33a   : > { %v2249_v56 = vpop.f32.mrf.mxu1 }
 0x33b   : > { %v2288_v57 = vpop.f32.mrf.mxu0  ;;  %v2250_v7 = vadd.f32 %v3497_v4, %v2249_v56 }
 0x342   : > { %v2251_v58 = vpop.f32.mrf.mxu1 }
 0x343   : > { %v2290_v59 = vpop.f32.mrf.mxu0  ;;  %v3498_v58 = vld [vmem:[%s619_s13] ss:$0 sm:$0xff] }
 0x346   : > { %v2262_v60 = vpop.f32.mrf.mxu2 }
 0x347   : > { %v2275_v61 = vpop.f32.mrf.mxu3  ;;  %v2263_v10 = vadd.f32 %v2262_v60, %v2250_v7 }
 0x349   : > { %v2276_v13 = vadd.f32 %v2275_v61, %v2263_v10 }
 0x34a   : > { %v2301_v62 = vpop.f32.mrf.mxu1 }
 0x34b   : > { %v2340_v63 = vpop.f32.mrf.mxu0  ;;  %v2289_v16 = vadd.f32 %v2288_v57, %v2276_v13 }
 0x34d   : > { %v2302_v19 = vadd.f32 %v2301_v62, %v2289_v16 }
 0x34e   : > { %v2264_v0 = vpop.f32.mrf.mxu2 }
 0x34f   : > { %v2277_v1 = vpop.f32.mrf.mxu3 }
 0x352   : > { %v2303_v2 = vpop.f32.mrf.mxu1 }
 0x353   : > { %v2342_v3 = vpop.f32.mrf.mxu0 }
 0x356   : > { %v2314_v5 = vpop.f32.mrf.mxu2 }
 0x357   : > { %v2327_v6 = vpop.f32.mrf.mxu3  ;;  %v2315_v21 = vadd.f32 %v2314_v5, %v2302_v19 }
 0x359   : > { %v2328_v22 = vadd.f32 %v2327_v6, %v2315_v21 }
 0x35a   : > { %v2353_v8 = vpop.f32.mrf.mxu1 }
 0x35b   : > { %v2392_v9 = vpop.f32.mrf.mxu0  ;;  %v2341_v27 = vadd.f32 %v2340_v63, %v2328_v22 }
 0x35d   : > { %v2354_v28 = vadd.f32 %v2353_v8, %v2341_v27 }
 0x35e   : > { %v2316_v11 = vpop.f32.mrf.mxu2 }
 0x35f   : > { %v2329_v12 = vpop.f32.mrf.mxu3 }
 0x362   : > { %v2355_v14 = vpop.f32.mrf.mxu1 }
 0x363   : > { %v2394_v15 = vpop.f32.mrf.mxu0 }
 0x366   : > { %v2366_v17 = vpop.f32.mrf.mxu2 }
 0x367   : > { %v2379_v18 = vpop.f32.mrf.mxu3  ;;  %v2367_v30 = vadd.f32 %v2366_v17, %v2354_v28 }
 0x369   : > { %v2380_v32 = vadd.f32 %v2379_v18, %v2367_v30 }
 0x36b   : > { %v2393_v35 = vadd.f32 %v2392_v9, %v2380_v32 }
 0x36e   : > { %v2368_v24 = vpop.f32.mrf.mxu2 }
 0x36f   : > { %v2381_v25 = vpop.f32.mrf.mxu3 }
 0x37a   : > { %v2405_v29 = vpop.f32.mrf.mxu1 }
 0x37b   : > { %v2444_v31 = vpop.f32.mrf.mxu0  ;;  %v2406_v37 = vadd.f32 %v2405_v29, %v2393_v35 }
 0x382   : > { %v2407_v33 = vpop.f32.mrf.mxu1 }
 0x383   : > { %v2446_v36 = vpop.f32.mrf.mxu0 }
 0x386   : > { %v2418_v38 = vpop.f32.mrf.mxu2 }
 0x387   : > { %v2419_v39 = vadd.f32 %v2418_v38, %v2406_v37  ;;  %v2431_v40 = vpop.f32.mrf.mxu3 }
 0x389   : > { %v2432_v41 = vadd.f32 %v2431_v40, %v2419_v39 }
 0x38b   : > { %v2445_v26 = vadd.f32 %v2444_v31, %v2432_v41 }
 0x38d   : > { %v2448_v42 = vadd.f32 %v2445_v26, %v3735_v34 }
 0x38e   : > { %v2420_v43 = vpop.f32.mrf.mxu2 }
 0x38f   : > { %v2433_v44 = vpop.f32.mrf.mxu3  ;;  %v2451_v45 = vsel %vm683_vm2, %v2448_v42, 0.0 }
 0x390   : > { %2452 = vadd.xlane.f32.xlu1 %v2451_v45 }
 0x403   : > { %v2453_v46 = vpop.xlane.xlu1 %2452 }
 0x404   : > { %v2454_v47 = vmul.f32 %v2453_v46, %v3678_v23 }
 0x406   : > { %v2455_v48 = vsub.f32 %v2448_v42, %v2454_v47 }
 0x408   : > { %v2456_v49 = vmul.f32 %v2455_v48, %v2455_v48 }
 0x40a   : > { %v2457_v20 = vsel %vm683_vm2, %v2456_v49, 0.0 }
 0x40b   : > { %2458 = vadd.xlane.f32.xlu1 %v2457_v20 }
 0x47e   : > { %v2459_v50 = vpop.xlane.xlu1 %2458 }
 0x47f   : > { %v2460_v51 = vmul.f32 %v2459_v50, %v3678_v23  ;;  %v3499_v23 = vld [vmem:[%s622_s23] ss:$0 sm:$0xff] }
 0x481   : > { %v2461_v52 = vadd.f32 1e-05, %v2460_v51 }
 0x483   : > { %3504 = vrsqrt.f32 %v2461_v52  ;;  %vm2468_vm8 = vweird.f32 %v2461_v52 }
 0x489   : > { %v3505_v34 = vpop.eup %3504 }
 0x48a   : > { %v2463_v53 = vmul.f32 %v3505_v34, %v2461_v52  ;;  %vm2469_vm7 = vweird.f32 %v3505_v34 }
 0x48b   : > { %vm2470_vm9 = vmor %vm2468_vm8, %vm2469_vm7 }
 0x48c   : > { %v2464_v54 = vmul.f32 %v3505_v34, %v2463_v53 }
 0x48e   : > { %v2465_v55 = vmul.f32 0.5, %v2464_v54 }
 0x490   : > { %v2466_v56 = vsub.f32 1.5, %v2465_v55 }
 0x492   : > { %v2467_v57 = vmul.f32 %v3505_v34, %v2466_v56 }
 0x494   : > { %v2471_v59 = vsel %vm2470_vm9, %v3505_v34, %v2467_v57 }
 0x495   : > { %v2472_v60 = vmul.f32 %v2471_v59, %v2455_v48 }
 0x497   : > { %v2476_v61 = vmul.f32 %v3498_v58, %v2472_v60  ;;  %2485 = sbr.rel (%p3315_p5) target bundleno = 1317 (0x525), region = 88 }
 0x499   : > { %v2480_v62 = vadd.f32 %v3499_v23, %v2476_v61 }
 0x49b   : > { %2481 = vst.msk [vmem:[#allocation2] sm:$0xff] %vm683_vm2, %v2480_v62 }
 0x49c   : > { %v2489_v63 = vld [vmem:[%s4019_s20 + $0x18] sm:$0xff]  ;;  %v2488_v0 = vld [vmem:[%s4020_s22 + $0x10] sm:$0xff]  ;;  %v2487_v1 = vld [vmem:[%s4020_s22 + $0x8] sm:$0xff]  ;;  %vm2517_vm10 = vcmask 7168  }
 0x49d   : > { %2509 = vmatpush.msra.mxu0 %v2489_v63  ;;  %v2486_v2 = vld [vmem:[%s4020_s22] sm:$0xff]  ;;  %v3506_v3 = vld [vmem:[#allocation3] ss:$0 sm:$0xff] }
 0x49f   : > { %2510 = vmatpush.msra.mxu0 %v2488_v0 }
 0x4a1   : > { %2511 = vmatpush.msra.mxu0 %v2487_v1 }
 0x4a3   : > { %2512 = vmatpush.msra.mxu0 %v2486_v2 }
 0x4a4   : > { %3316 = vmatmul.msk.f32.vlgmr.msra.gmra.mxu0 %vm683_vm2, %v2480_v62 }
 0x521   : > { %v2514_v4 = vpop.f32.mrf.mxu0 }
 0x522   : > { %v2515_v5 = vadd.f32 %v3506_v3, %v2514_v4 }
 0x524   : > { %2518 = vst.msk [vmem:[%s4021_s16] sm:$0xff] %vm2517_vm10, %v2515_v5 }
 0x525 PF: > { %s4022_s26 = sld [smem:[#allocation4_spill]] }
 0x52b   : > { %s27_s20 = sadd.s32 1, %s4022_s26  }
 0x52c   : > { %p24_p6 = scmp.ge.s32.totalorder %s27_s20, 4  }
 0x52e   :  { %26 = sbr.rel (!%p24_p6) target bundleno = 5 (0x5), region = 141 }

</bundles_post_ra>
